<compile_context>
chip_gen: v6e
topology: v6e:2x2x1
jax: 0.10.0
libtpu: 0.0.40
codegen_flags: <defaults>
</compile_context>

<pallas_src>
import math
import functools

import jax
import jax.numpy as jnp
from jax import lax
from jax.experimental import pallas as pl
from jax.experimental.pallas import tpu as pltpu


def _round_up(x, m):
    return ((x + m - 1) // m) * m


def _vmem_limit(nbytes):
    # Raise the scoped-VMEM limit above the 16/32 MiB defaults when needed, but
    # never above v7x's 64 MiB physical VMEM.
    return int(min(max(2 * nbytes, 32 << 20), 64 << 20))


# ---------------------------------------------------------------------------
# Parameter preparation (done once; no per-call weight transposes).
# ---------------------------------------------------------------------------
def prepare_params(params, *, matmul_dtype=jnp.bfloat16, gi_dtype=jnp.bfloat16):
    w_ih, w_hh = params["w_ih"], params["w_hh"]
    b_ih, b_hh = params["b_ih"], params["b_hh"]
    w_out, b_out = params["w_out"], params["b_out"]

    V = w_out.shape[0]
    H = w_hh.shape[1]
    H_pad = _round_up(H, 128)
    V_pad = _round_up(V, 128)

    b_ih3 = b_ih.reshape(3, H).astype(jnp.float32)
    b_hh3 = b_hh.reshape(3, H).astype(jnp.float32)
    # Fold b_hh for r/z into the gather table; b_hh_n must stay inside r*(...).
    fold = b_ih3 + jnp.concatenate(
        [b_hh3[:2], jnp.zeros((1, H), jnp.float32)], axis=0)            # (3, H)

    # Gather table: gi[token] = W_ih^T[token] + folded biases.   (V, 3, H_pad)
    gi_table = jnp.transpose(w_ih).reshape(V, 3, H).astype(jnp.float32) + fold[None]
    gi_table = jnp.pad(gi_table, ((0, 0), (0, 0), (0, H_pad - H))).astype(gi_dtype)

    # Per-gate W_hh^T, gate-major packed:  (H_pad, 3*H_pad)  [r | z | n]
    whh_g = jnp.transpose(w_hh.reshape(3, H, H), (0, 2, 1)).astype(jnp.float32)
    whh_g = jnp.pad(whh_g, ((0, 0), (0, H_pad - H), (0, H_pad - H)))
    whh_packed = jnp.concatenate(
        [whh_g[0], whh_g[1], whh_g[2]], axis=1).astype(matmul_dtype)

    b_hn = jnp.pad(b_hh3[2:3], ((0, 0), (0, H_pad - H)))                # (1, H_pad) f32

    wout_t = jnp.pad(jnp.transpose(w_out).astype(jnp.float32),
                     ((0, H_pad - H), (0, V_pad - V))).astype(matmul_dtype)
    bout = jnp.pad(b_out.reshape(1, V).astype(jnp.float32),
                   ((0, 0), (0, V_pad - V)))                            # (1, V_pad) f32

    return {
        "gi_table": gi_table, "whh": whh_packed, "b_hn": b_hn,
        "wout_t": wout_t, "b_out": bout,
        "H": H, "H_pad": H_pad, "V": V, "V_pad": V_pad,
    }


# ---------------------------------------------------------------------------
# Tile selection for the recurrent kernel (VMEM-budget aware).
# ---------------------------------------------------------------------------
def _choose_recurrent_tiles(S, B_pad, H_pad, gi_bytes, w_bytes, budget=40 << 20):
    def need(tt, bb):
        gi = 2 * tt * 3 * bb * H_pad * gi_bytes      # gi blocks (double-buffered)
        hseq = 2 * tt * bb * H_pad * 4               # hseq output blocks
        whh = 2 * 3 * H_pad * H_pad * w_bytes        # packed W_hh (default 2 bufs)
        carry = 2 * 2 * bb * H_pad * 4               # h0 in + hout carry
        return gi + hseq + whh + carry + (1 << 20)

    # Batch block: multiple of 8, divides B_pad, <= 64, and <= B_pad//2 when
    # B_pad >= 16 so the "parallel" batch axis feeds >= 2 TensorCores on v7x.
    bb_cap = 64 if B_pad < 16 else min(64, B_pad // 2)
    bb_cands = [d for d in range(8, B_pad + 1, 8)
                if B_pad % d == 0 and d <= bb_cap] or [8]
    bb_cands.sort(reverse=True)

    for bb in bb_cands:
        tt = min(8, S)                               # 8 steps already amortize overhead
        while tt > 1 and need(tt, bb) > budget:
            tt //= 2
        if need(tt, bb) <= budget:
            return tt, bb, need(tt, bb)
    bb = bb_cands[-1]
    return 1, bb, need(1, bb)


# ---------------------------------------------------------------------------
# Kernel 1: sequential GRU recurrence, tt timesteps per grid step.
# ---------------------------------------------------------------------------
def _gru_recurrent_kernel(gi_ref, h0_ref, whh_ref, bhn_ref,
                          hseq_ref, hout_ref, *, t_block, seq_len, hidden, mask_tail):
    # gi_ref  : (tt, 3, bb, H_pad)  bf16 input projections (+ folded biases)
    # h0_ref  : (bb, H_pad)         initial hidden state (f32)
    # whh_ref : (H_pad, 3*H_pad)    packed per-gate hidden weights (bf16/f32)
    # bhn_ref : (1, H_pad)          hidden bias of the n gate (f32)
    # hseq_ref: (tt, bb, H_pad)     per-step hidden states (f32 output)
    # hout_ref: (bb, H_pad)         final hidden state; VMEM-resident carry
    si = pl.program_id(1)  # time-block index (sequential / "arbitrary")

    @pl.when(si == 0)
    def _():
        hout_ref[...] = h0_ref[...]

    # Hoist loop-invariant loads / broadcasts out of the unrolled step loop.
    whh = whh_ref[...]                                         # (H_pad, 3*H_pad)
    b_hn = jnp.broadcast_to(bhn_ref[...], hout_ref.shape)      # (bb, H_pad) f32
    H = hidden

    def step(t, h):
        gi_t = gi_ref[t].astype(jnp.float32)                   # (3, bb, H_pad)
        # One fused MXU dot per timestep: (bb, H_pad) @ (H_pad, 3*H_pad).
        gh = jnp.dot(h.astype(whh.dtype), whh,
                     preferred_element_type=jnp.float32)       # (bb, 3*H_pad)
        r = jax.nn.sigmoid(gi_t[0] + gh[:, :H])                # biases pre-folded
        z = jax.nn.sigmoid(gi_t[1] + gh[:, H:2 * H])
        n = jnp.tanh(gi_t[2] + r * (gh[:, 2 * H:] + b_hn))     # b_hh_n inside r*(...)
        h_new = (1.0 - z) * n + z * h
        if mask_tail:                                          # only when S was padded
            valid = (si * t_block + t) < seq_len
            h_new = jnp.where(valid, h_new, h)
        hseq_ref[t] = h_new.astype(hseq_ref.dtype)
        return h_new

    h_final = lax.fori_loop(0, t_block, step, hout_ref[...], unroll=True)
    hout_ref[...] = h_final


# ---------------------------------------------------------------------------
# Kernel 2: hoisted output Linear, fully parallel 2-D tiled matmul.
# ---------------------------------------------------------------------------
def _linear_kernel(h_ref, w_ref, b_ref, o_ref):
    acc = jnp.dot(h_ref[...].astype(w_ref.dtype), w_ref[...],
                  preferred_element_type=jnp.float32)
    o_ref[...] = (acc + b_ref[...]).astype(o_ref.dtype)


# ---------------------------------------------------------------------------
# Wrapper matching GRUModel.forward semantics.
# ---------------------------------------------------------------------------
def gru_model_forward(tokens, h0, prepared):
    """tokens: (B, S) int32; h0: (1, B, H) float32; prepared: prepare_params(...).

    Returns (output, state) with output: (S*B, V), state: (1, B, H),
    matching GRUModel.forward (seq-first GRU + Linear over flattened Y).
    """
    H, H_pad = prepared["H"], prepared["H_pad"]
    V, V_pad = prepared["V"], prepared["V_pad"]
    B, S = tokens.shape

    gi_bytes = prepared["gi_table"].dtype.itemsize
    w_bytes = prepared["whh"].dtype.itemsize

    # ---- Stage 0 (XLA glue, fully parallel): token gather replaces one-hot matmul.
    gi = jnp.take(prepared["gi_table"], tokens.T, axis=0)       # (S, B, 3, H_pad)
    gi = jnp.transpose(gi, (0, 2, 1, 3))                        # (S, 3, B, H_pad)

    # ---- Tiling: batch padded to x8, S padded to a multiple of tt (masked tail).
    B_pad = _round_up(max(B, 8), 8)
    tt, bb, rec_need = _choose_recurrent_tiles(S, B_pad, H_pad, gi_bytes, w_bytes)
    S_pad = _round_up(S, tt)
    if (S_pad, B_pad) != (S, B):
        gi = jnp.pad(gi, ((0, S_pad - S), (0, 0), (0, B_pad - B), (0, 0)))
    h0_2d = jnp.pad(h0[0].astype(jnp.float32),
                    ((0, B_pad - B), (0, H_pad - H)))
    nb = B_pad // bb
    nt = S_pad // tt

    rec_kernel = functools.partial(
        _gru_recurrent_kernel, t_block=tt, seq_len=S, hidden=H_pad,
        mask_tail=(S_pad != S))

    h_seq, h_last = pl.pallas_call(
        rec_kernel,
        out_shape=(
            jax.ShapeDtypeStruct((S_pad, B_pad, H_pad), jnp.float32),  # per-step hidden
            jax.ShapeDtypeStruct((B_pad, H_pad), jnp.float32),         # final hidden
        ),
        grid_spec=pltpu.PrefetchScalarGridSpec(
            num_scalar_prefetch=0,
            grid=(nb, nt),                               # (batch-parallel, time-sequential)
            in_specs=[
                pl.BlockSpec((tt, 3, bb, H_pad), lambda bi, si: (si, 0, bi, 0)),  # gi
                pl.BlockSpec((bb, H_pad),        lambda bi, si: (bi, 0)),         # h0
                pl.BlockSpec((H_pad, 3 * H_pad), lambda bi, si: (0, 0)),          # W_hh
                pl.BlockSpec((1, H_pad),         lambda bi, si: (0, 0)),          # b_hn
            ],
            out_specs=[
                pl.BlockSpec((tt, bb, H_pad), lambda bi, si: (si, bi, 0)),        # h/step
                pl.BlockSpec((bb, H_pad),     lambda bi, si: (bi, 0)),            # carry
            ],
        ),
        compiler_params=pltpu.CompilerParams(
            dimension_semantics=("parallel", "arbitrary"),
            vmem_limit_bytes=_vmem_limit(rec_need)),
    )(gi, h0_2d, prepared["whh"], prepared["b_hn"])

    # ---- Stage 2: hoisted output Linear as one large parallel tiled matmul.
    h_mat = h_seq[:S, :B, :].reshape(S * B, H_pad)   # matches Y.reshape(-1, H) (H padded w/ zeros)
    M = S * B
    tm = 256 if M >= 256 else _round_up(M, 8)
    M_pad = _round_up(M, tm)
    if M_pad != M:
        h_mat = jnp.pad(h_mat, ((0, M_pad - M), (0, 0)))
    tn = next(t for t in (512, 256, 128) if V_pad % t == 0)

    lin_need = 2 * (tm * H_pad * 4 + H_pad * tn * w_bytes + tn * 4 + tm * tn * 4) + (1 << 20)

    logits = pl.pallas_call(
        _linear_kernel,
        out_shape=jax.ShapeDtypeStruct((M_pad, V_pad), jnp.float32),
        grid_spec=pltpu.PrefetchScalarGridSpec(
            num_scalar_prefetch=0,
            grid=(M_pad // tm, V_pad // tn),
            in_specs=[
                pl.BlockSpec((tm, H_pad), lambda i, j: (i, 0)),
                pl.BlockSpec((H_pad, tn), lambda i, j: (0, j)),
                pl.BlockSpec((1, tn),     lambda i, j: (0, j)),
            ],
            out_specs=pl.BlockSpec((tm, tn), lambda i, j: (i, j)),
        ),
        compiler_params=pltpu.CompilerParams(
            dimension_semantics=("parallel", "parallel"),
            vmem_limit_bytes=_vmem_limit(lin_need)),
    )(h_mat, prepared["wout_t"], prepared["b_out"])

    output = logits[:M, :V]                           # (S*B, V)
    state = h_last[:B, :H].reshape(1, B, H)           # (1, B, H)
    return output, state


# ---------------------------------------------------------------------------
# Pure-JAX f32 reference (matches nn.GRU + nn.Linear semantics) for verification.
# ---------------------------------------------------------------------------
def _reference_forward(tokens, h0, params):
    w_ih, w_hh, b_ih, b_hh, w_out, b_out = (
        params["w_ih"], params["w_hh"], params["b_ih"],
        params["b_hh"], params["w_out"], params["b_out"],
    )
    V = w_out.shape[0]
    H = w_hh.shape[1]
    x = jax.nn.one_hot(tokens.T, V, dtype=jnp.float32)   # (S, B, V)
    h = h0[0]
    ys = []
    for t in range(x.shape[0]):
        gi = x[t] @ w_ih.T + b_ih
        gh = h @ w_hh.T + b_hh
        r = jax.nn.sigmoid(gi[:, :H] + gh[:, :H])
        z = jax.nn.sigmoid(gi[:, H:2 * H] + gh[:, H:2 * H])
        n = jnp.tanh(gi[:, 2 * H:] + r * gh[:, 2 * H:])
        h = (1.0 - z) * n + z * h
        ys.append(h)
    Y = jnp.stack(ys, 0)                                  # (S, B, H)
    out = Y.reshape(-1, H) @ w_out.T + b_out
    return out, h.reshape(1, *h.shape)


def init_params(key, vocab_size, hidden_size):
    """Deterministic init mirroring PyTorch's U(-1/sqrt(H), 1/sqrt(H))."""
    k = 1.0 / math.sqrt(hidden_size)
    keys = jax.random.split(key, 6)
    u = lambda kk, shape: jax.random.uniform(kk, shape, jnp.float32, -k, k)
    return {
        "w_ih": u(keys[0], (3 * hidden_size, vocab_size)),
        "w_hh": u(keys[1], (3 * hidden_size, hidden_size)),
        "b_ih": u(keys[2], (3 * hidden_size,)),
        "b_hh": u(keys[3], (3 * hidden_size,)),
        "w_out": u(keys[4], (vocab_size, hidden_size)),
        "b_out": u(keys[5], (vocab_size,)),
    }


if __name__ == "__main__":
    VOCAB = 32
    HIDDEN = 32
    BATCH = 4
    SEQ = 8

    key = jax.random.PRNGKey(0)
    pkey, tkey = jax.random.split(key)
    params = init_params(pkey, VOCAB, HIDDEN)

    tokens = jax.random.randint(tkey, (BATCH, SEQ), 0, VOCAB, dtype=jnp.int32)
    h0 = jnp.zeros((1, BATCH, HIDDEN), jnp.float32)   # GRUModel.begin_state

    prepared = prepare_params(params)                 # bf16 MXU operands by default
    out, state = gru_model_forward(tokens, h0, prepared)
    out = jax.block_until_ready(out)
    state = jax.block_until_ready(state)

    ref_out, ref_state = _reference_forward(tokens, h0, params)
    assert out.shape == (SEQ * BATCH, VOCAB)
    assert state.shape == (1, BATCH, HIDDEN)
    # bf16 MXU operands / bf16 gi stream -> relaxed tolerance vs. the f32 reference.
    assert jnp.allclose(out, ref_out, atol=3e-2, rtol=3e-2)
    assert jnp.allclose(state, ref_state, atol=3e-2, rtol=3e-2)

    print("KERNEL_OK")
</pallas_src>

<mosaic_0001>
module attributes {stable_mosaic.version = 11 : i64} {
  func.func @_gru_recurrent_kernel(%arg0: i32, %arg1: i32, %arg2: memref<8x3x8x128xbf16, #tpu.memory_space<vmem>>, %arg3: memref<8x128xf32, #tpu.memory_space<vmem>>, %arg4: memref<128x384xbf16, #tpu.memory_space<vmem>>, %arg5: memref<1x128xf32, #tpu.memory_space<vmem>>, %arg6: memref<8x8x128xf32, #tpu.memory_space<vmem>>, %arg7: memref<8x128xf32, #tpu.memory_space<vmem>>) attributes {dimension_semantics = [#tpu.dimension_semantics<parallel>, #tpu.dimension_semantics<arbitrary>], iteration_bounds = array<i64: 1, 1>, scalar_prefetch = 0 : i64, scratch_operands = 0 : i64, tpu.core_type = #tpu.core_type<tc>, window_params = [{transform_indices = @transform_0, window_bounds = array<i64: 8, 3, 8, 128>}, {transform_indices = @transform_1, window_bounds = array<i64: 8, 128>}, {pipeline_mode = #tpu.pipeline_mode<synchronous>, transform_indices = @transform_2, window_bounds = array<i64: 128, 384>}, {pipeline_mode = #tpu.pipeline_mode<synchronous>, transform_indices = @transform_3, window_bounds = array<i64: 1, 128>}, {transform_indices = @transform_4, window_bounds = array<i64: 8, 8, 128>}, {transform_indices = @transform_5, window_bounds = array<i64: 8, 128>}]} {
    %c0_i32 = arith.constant 0 : i32
    %0 = arith.cmpi eq, %arg1, %c0_i32 : i32
    %1 = arith.extui %0 : i1 to i32
    %c0_i32_0 = arith.constant 0 : i32
    %2 = arith.cmpi ne, %1, %c0_i32_0 : i32
    scf.if %2 {
      %c0_80 = arith.constant 0 : index
      %c0_81 = arith.constant 0 : index
      %329 = vector.load %arg3[%c0_80, %c0_81] : memref<8x128xf32, #tpu.memory_space<vmem>>, vector<8x128xf32>
      %c0_82 = arith.constant 0 : index
      %c0_83 = arith.constant 0 : index
      %330 = vector.load %arg7[%c0_82, %c0_83] : memref<8x128xf32, #tpu.memory_space<vmem>>, vector<8x128xf32>
      tpu.vector_store %arg7[%c0_82, %c0_83], %329 {strides = array<i32>} : memref<8x128xf32, #tpu.memory_space<vmem>>, vector<8x128xf32>,
    } else {
    }
    %c0 = arith.constant 0 : index
    %c0_1 = arith.constant 0 : index
    %3 = vector.load %arg4[%c0, %c0_1] : memref<128x384xbf16, #tpu.memory_space<vmem>>, vector<128x384xbf16>
    %c0_2 = arith.constant 0 : index
    %c0_3 = arith.constant 0 : index
    %4 = vector.load %arg5[%c0_2, %c0_3] : memref<1x128xf32, #tpu.memory_space<vmem>>, vector<1x128xf32>
    %5 = vector.shape_cast %4 : vector<1x128xf32> to vector<1x128xf32>
    %6 = vector.broadcast %5 : vector<1x128xf32> to vector<8x128xf32>
    %c0_4 = arith.constant 0 : index
    %c0_5 = arith.constant 0 : index
    %7 = vector.load %arg7[%c0_4, %c0_5] : memref<8x128xf32, #tpu.memory_space<vmem>>, vector<8x128xf32>
    %c0_i32_6 = arith.constant 0 : i32
    %8 = arith.index_cast %c0_i32_6 : i32 to index
    %c0_7 = arith.constant 0 : index
    %c0_8 = arith.constant 0 : index
    %c0_9 = arith.constant 0 : index
    %9 = vector.load %arg2[%8, %c0_7, %c0_8, %c0_9] : memref<8x3x8x128xbf16, #tpu.memory_space<vmem>>, vector<1x3x8x128xbf16>
    %10 = vector.shape_cast %9 : vector<1x3x8x128xbf16> to vector<3x8x128xbf16>
    %11 = arith.extf %10 : vector<3x8x128xbf16> to vector<3x8x128xf32>
    %12 = arith.truncf %7 : vector<8x128xf32> to vector<8x128xbf16>
    %cst = arith.constant dense<0.000000e+00> : vector<8x384xf32>
    %13 = tpu.matmul %12, %3, %cst {dimension_numbers = #tpu.dot_dimension_numbers<[1], [0], [0], [1], [0, 0, 1, 1], [], []>} : vector<8x128xbf16>, vector<128x384xbf16>, vector<8x384xf32> -> vector<8x384xf32>
    %14 = vector.extract_strided_slice %11 {offsets = [0, 0, 0], sizes = [1, 8, 128], strides = [1, 1, 1]} : vector<3x8x128xf32> to vector<1x8x128xf32>
    %15 = vector.shape_cast %14 : vector<1x8x128xf32> to vector<8x128xf32>
    %16 = vector.extract_strided_slice %13 {offsets = [0, 0], sizes = [8, 128], strides = [1, 1]} : vector<8x384xf32> to vector<8x128xf32>
    %17 = arith.addf %15, %16 : vector<8x128xf32>
    %18 = arith.negf %17 : vector<8x128xf32>
    %19 = math.exp %18 : vector<8x128xf32>
    %cst_10 = arith.constant 1.000000e+00 : f32
    %20 = vector.broadcast %cst_10 : f32 to vector<8x128xf32>
    %21 = arith.addf %20, %19 : vector<8x128xf32>
    %22 = arith.divf %20, %21 : vector<8x128xf32>
    %23 = vector.extract_strided_slice %11 {offsets = [1, 0, 0], sizes = [1, 8, 128], strides = [1, 1, 1]} : vector<3x8x128xf32> to vector<1x8x128xf32>
    %24 = vector.shape_cast %23 : vector<1x8x128xf32> to vector<8x128xf32>
    %25 = vector.extract_strided_slice %13 {offsets = [0, 128], sizes = [8, 128], strides = [1, 1]} : vector<8x384xf32> to vector<8x128xf32>
    %26 = arith.addf %24, %25 : vector<8x128xf32>
    %27 = arith.negf %26 : vector<8x128xf32>
    %28 = math.exp %27 : vector<8x128xf32>
    %cst_11 = arith.constant 1.000000e+00 : f32
    %29 = vector.broadcast %cst_11 : f32 to vector<8x128xf32>
    %30 = arith.addf %29, %28 : vector<8x128xf32>
    %31 = arith.divf %29, %30 : vector<8x128xf32>
    %32 = vector.extract_strided_slice %11 {offsets = [2, 0, 0], sizes = [1, 8, 128], strides = [1, 1, 1]} : vector<3x8x128xf32> to vector<1x8x128xf32>
    %33 = vector.shape_cast %32 : vector<1x8x128xf32> to vector<8x128xf32>
    %34 = vector.extract_strided_slice %13 {offsets = [0, 256], sizes = [8, 128], strides = [1, 1]} : vector<8x384xf32> to vector<8x128xf32>
    %35 = arith.addf %34, %6 : vector<8x128xf32>
    %36 = arith.mulf %22, %35 : vector<8x128xf32>
    %37 = arith.addf %33, %36 : vector<8x128xf32>
    %38 = math.tanh %37 : vector<8x128xf32>
    %cst_12 = arith.constant 1.000000e+00 : f32
    %39 = vector.broadcast %cst_12 : f32 to vector<8x128xf32>
    %40 = arith.subf %39, %31 : vector<8x128xf32>
    %41 = arith.mulf %40, %38 : vector<8x128xf32>
    %42 = arith.mulf %31, %7 : vector<8x128xf32>
    %43 = arith.addf %41, %42 : vector<8x128xf32>
    %44 = arith.index_cast %c0_i32_6 : i32 to index
    %c0_13 = arith.constant 0 : index
    %c0_14 = arith.constant 0 : index
    %45 = vector.load %arg6[%44, %c0_13, %c0_14] : memref<8x8x128xf32, #tpu.memory_space<vmem>>, vector<1x8x128xf32>
    %46 = vector.shape_cast %45 : vector<1x8x128xf32> to vector<8x128xf32>
    %47 = vector.shape_cast %43 : vector<8x128xf32> to vector<1x8x128xf32>
    tpu.vector_store %arg6[%44, %c0_13, %c0_14], %47 {strides = array<i32>} : memref<8x8x128xf32, #tpu.memory_space<vmem>>, vector<1x8x128xf32>,
    %c1_i32 = arith.constant 1 : i32
    %48 = arith.index_cast %c1_i32 : i32 to index
    %c0_15 = arith.constant 0 : index
    %c0_16 = arith.constant 0 : index
    %c0_17 = arith.constant 0 : index
    %49 = vector.load %arg2[%48, %c0_15, %c0_16, %c0_17] : memref<8x3x8x128xbf16, #tpu.memory_space<vmem>>, vector<1x3x8x128xbf16>
    %50 = vector.shape_cast %49 : vector<1x3x8x128xbf16> to vector<3x8x128xbf16>
    %51 = arith.extf %50 : vector<3x8x128xbf16> to vector<3x8x128xf32>
    %52 = arith.truncf %43 : vector<8x128xf32> to vector<8x128xbf16>
    %cst_18 = arith.constant dense<0.000000e+00> : vector<8x384xf32>
    %53 = tpu.matmul %52, %3, %cst_18 {dimension_numbers = #tpu.dot_dimension_numbers<[1], [0], [0], [1], [0, 0, 1, 1], [], []>} : vector<8x128xbf16>, vector<128x384xbf16>, vector<8x384xf32> -> vector<8x384xf32>
    %54 = vector.extract_strided_slice %51 {offsets = [0, 0, 0], sizes = [1, 8, 128], strides = [1, 1, 1]} : vector<3x8x128xf32> to vector<1x8x128xf32>
    %55 = vector.shape_cast %54 : vector<1x8x128xf32> to vector<8x128xf32>
    %56 = vector.extract_strided_slice %53 {offsets = [0, 0], sizes = [8, 128], strides = [1, 1]} : vector<8x384xf32> to vector<8x128xf32>
    %57 = arith.addf %55, %56 : vector<8x128xf32>
    %58 = arith.negf %57 : vector<8x128xf32>
    %59 = math.exp %58 : vector<8x128xf32>
    %cst_19 = arith.constant 1.000000e+00 : f32
    %60 = vector.broadcast %cst_19 : f32 to vector<8x128xf32>
    %61 = arith.addf %60, %59 : vector<8x128xf32>
    %62 = arith.divf %60, %61 : vector<8x128xf32>
    %63 = vector.extract_strided_slice %51 {offsets = [1, 0, 0], sizes = [1, 8, 128], strides = [1, 1, 1]} : vector<3x8x128xf32> to vector<1x8x128xf32>
    %64 = vector.shape_cast %63 : vector<1x8x128xf32> to vector<8x128xf32>
    %65 = vector.extract_strided_slice %53 {offsets = [0, 128], sizes = [8, 128], strides = [1, 1]} : vector<8x384xf32> to vector<8x128xf32>
    %66 = arith.addf %64, %65 : vector<8x128xf32>
    %67 = arith.negf %66 : vector<8x128xf32>
    %68 = math.exp %67 : vector<8x128xf32>
    %cst_20 = arith.constant 1.000000e+00 : f32
    %69 = vector.broadcast %cst_20 : f32 to vector<8x128xf32>
    %70 = arith.addf %69, %68 : vector<8x128xf32>
    %71 = arith.divf %69, %70 : vector<8x128xf32>
    %72 = vector.extract_strided_slice %51 {offsets = [2, 0, 0], sizes = [1, 8, 128], strides = [1, 1, 1]} : vector<3x8x128xf32> to vector<1x8x128xf32>
    %73 = vector.shape_cast %72 : vector<1x8x128xf32> to vector<8x128xf32>
    %74 = vector.extract_strided_slice %53 {offsets = [0, 256], sizes = [8, 128], strides = [1, 1]} : vector<8x384xf32> to vector<8x128xf32>
    %75 = arith.addf %74, %6 : vector<8x128xf32>
    %76 = arith.mulf %62, %75 : vector<8x128xf32>
    %77 = arith.addf %73, %76 : vector<8x128xf32>
    %78 = math.tanh %77 : vector<8x128xf32>
    %cst_21 = arith.constant 1.000000e+00 : f32
    %79 = vector.broadcast %cst_21 : f32 to vector<8x128xf32>
    %80 = arith.subf %79, %71 : vector<8x128xf32>
    %81 = arith.mulf %80, %78 : vector<8x128xf32>
    %82 = arith.mulf %71, %43 : vector<8x128xf32>
    %83 = arith.addf %81, %82 : vector<8x128xf32>
    %84 = arith.index_cast %c1_i32 : i32 to index
    %c0_22 = arith.constant 0 : index
    %c0_23 = arith.constant 0 : index
    %85 = vector.load %arg6[%84, %c0_22, %c0_23] : memref<8x8x128xf32, #tpu.memory_space<vmem>>, vector<1x8x128xf32>
    %86 = vector.shape_cast %85 : vector<1x8x128xf32> to vector<8x128xf32>
    %87 = vector.shape_cast %83 : vector<8x128xf32> to vector<1x8x128xf32>
    tpu.vector_store %arg6[%84, %c0_22, %c0_23], %87 {strides = array<i32>} : memref<8x8x128xf32, #tpu.memory_space<vmem>>, vector<1x8x128xf32>,
    %c2_i32 = arith.constant 2 : i32
    %88 = arith.index_cast %c2_i32 : i32 to index
    %c0_24 = arith.constant 0 : index
    %c0_25 = arith.constant 0 : index
    %c0_26 = arith.constant 0 : index
    %89 = vector.load %arg2[%88, %c0_24, %c0_25, %c0_26] : memref<8x3x8x128xbf16, #tpu.memory_space<vmem>>, vector<1x3x8x128xbf16>
    %90 = vector.shape_cast %89 : vector<1x3x8x128xbf16> to vector<3x8x128xbf16>
    %91 = arith.extf %90 : vector<3x8x128xbf16> to vector<3x8x128xf32>
    %92 = arith.truncf %83 : vector<8x128xf32> to vector<8x128xbf16>
    %cst_27 = arith.constant dense<0.000000e+00> : vector<8x384xf32>
    %93 = tpu.matmul %92, %3, %cst_27 {dimension_numbers = #tpu.dot_dimension_numbers<[1], [0], [0], [1], [0, 0, 1, 1], [], []>} : vector<8x128xbf16>, vector<128x384xbf16>, vector<8x384xf32> -> vector<8x384xf32>
    %94 = vector.extract_strided_slice %91 {offsets = [0, 0, 0], sizes = [1, 8, 128], strides = [1, 1, 1]} : vector<3x8x128xf32> to vector<1x8x128xf32>
    %95 = vector.shape_cast %94 : vector<1x8x128xf32> to vector<8x128xf32>
    %96 = vector.extract_strided_slice %93 {offsets = [0, 0], sizes = [8, 128], strides = [1, 1]} : vector<8x384xf32> to vector<8x128xf32>
    %97 = arith.addf %95, %96 : vector<8x128xf32>
    %98 = arith.negf %97 : vector<8x128xf32>
    %99 = math.exp %98 : vector<8x128xf32>
    %cst_28 = arith.constant 1.000000e+00 : f32
    %100 = vector.broadcast %cst_28 : f32 to vector<8x128xf32>
    %101 = arith.addf %100, %99 : vector<8x128xf32>
    %102 = arith.divf %100, %101 : vector<8x128xf32>
    %103 = vector.extract_strided_slice %91 {offsets = [1, 0, 0], sizes = [1, 8, 128], strides = [1, 1, 1]} : vector<3x8x128xf32> to vector<1x8x128xf32>
    %104 = vector.shape_cast %103 : vector<1x8x128xf32> to vector<8x128xf32>
    %105 = vector.extract_strided_slice %93 {offsets = [0, 128], sizes = [8, 128], strides = [1, 1]} : vector<8x384xf32> to vector<8x128xf32>
    %106 = arith.addf %104, %105 : vector<8x128xf32>
    %107 = arith.negf %106 : vector<8x128xf32>
    %108 = math.exp %107 : vector<8x128xf32>
    %cst_29 = arith.constant 1.000000e+00 : f32
    %109 = vector.broadcast %cst_29 : f32 to vector<8x128xf32>
    %110 = arith.addf %109, %108 : vector<8x128xf32>
    %111 = arith.divf %109, %110 : vector<8x128xf32>
    %112 = vector.extract_strided_slice %91 {offsets = [2, 0, 0], sizes = [1, 8, 128], strides = [1, 1, 1]} : vector<3x8x128xf32> to vector<1x8x128xf32>
    %113 = vector.shape_cast %112 : vector<1x8x128xf32> to vector<8x128xf32>
    %114 = vector.extract_strided_slice %93 {offsets = [0, 256], sizes = [8, 128], strides = [1, 1]} : vector<8x384xf32> to vector<8x128xf32>
    %115 = arith.addf %114, %6 : vector<8x128xf32>
    %116 = arith.mulf %102, %115 : vector<8x128xf32>
    %117 = arith.addf %113, %116 : vector<8x128xf32>
    %118 = math.tanh %117 : vector<8x128xf32>
    %cst_30 = arith.constant 1.000000e+00 : f32
    %119 = vector.broadcast %cst_30 : f32 to vector<8x128xf32>
    %120 = arith.subf %119, %111 : vector<8x128xf32>
    %121 = arith.mulf %120, %118 : vector<8x128xf32>
    %122 = arith.mulf %111, %83 : vector<8x128xf32>
    %123 = arith.addf %121, %122 : vector<8x128xf32>
    %124 = arith.index_cast %c2_i32 : i32 to index
    %c0_31 = arith.constant 0 : index
    %c0_32 = arith.constant 0 : index
    %125 = vector.load %arg6[%124, %c0_31, %c0_32] : memref<8x8x128xf32, #tpu.memory_space<vmem>>, vector<1x8x128xf32>
    %126 = vector.shape_cast %125 : vector<1x8x128xf32> to vector<8x128xf32>
    %127 = vector.shape_cast %123 : vector<8x128xf32> to vector<1x8x128xf32>
    tpu.vector_store %arg6[%124, %c0_31, %c0_32], %127 {strides = array<i32>} : memref<8x8x128xf32, #tpu.memory_space<vmem>>, vector<1x8x128xf32>,
    %c3_i32 = arith.constant 3 : i32
    %128 = arith.index_cast %c3_i32 : i32 to index
    %c0_33 = arith.constant 0 : index
    %c0_34 = arith.constant 0 : index
    %c0_35 = arith.constant 0 : index
    %129 = vector.load %arg2[%128, %c0_33, %c0_34, %c0_35] : memref<8x3x8x128xbf16, #tpu.memory_space<vmem>>, vector<1x3x8x128xbf16>
    %130 = vector.shape_cast %129 : vector<1x3x8x128xbf16> to vector<3x8x128xbf16>
    %131 = arith.extf %130 : vector<3x8x128xbf16> to vector<3x8x128xf32>
    %132 = arith.truncf %123 : vector<8x128xf32> to vector<8x128xbf16>
    %cst_36 = arith.constant dense<0.000000e+00> : vector<8x384xf32>
    %133 = tpu.matmul %132, %3, %cst_36 {dimension_numbers = #tpu.dot_dimension_numbers<[1], [0], [0], [1], [0, 0, 1, 1], [], []>} : vector<8x128xbf16>, vector<128x384xbf16>, vector<8x384xf32> -> vector<8x384xf32>
    %134 = vector.extract_strided_slice %131 {offsets = [0, 0, 0], sizes = [1, 8, 128], strides = [1, 1, 1]} : vector<3x8x128xf32> to vector<1x8x128xf32>
    %135 = vector.shape_cast %134 : vector<1x8x128xf32> to vector<8x128xf32>
    %136 = vector.extract_strided_slice %133 {offsets = [0, 0], sizes = [8, 128], strides = [1, 1]} : vector<8x384xf32> to vector<8x128xf32>
    %137 = arith.addf %135, %136 : vector<8x128xf32>
    %138 = arith.negf %137 : vector<8x128xf32>
    %139 = math.exp %138 : vector<8x128xf32>
    %cst_37 = arith.constant 1.000000e+00 : f32
    %140 = vector.broadcast %cst_37 : f32 to vector<8x128xf32>
    %141 = arith.addf %140, %139 : vector<8x128xf32>
    %142 = arith.divf %140, %141 : vector<8x128xf32>
    %143 = vector.extract_strided_slice %131 {offsets = [1, 0, 0], sizes = [1, 8, 128], strides = [1, 1, 1]} : vector<3x8x128xf32> to vector<1x8x128xf32>
    %144 = vector.shape_cast %143 : vector<1x8x128xf32> to vector<8x128xf32>
    %145 = vector.extract_strided_slice %133 {offsets = [0, 128], sizes = [8, 128], strides = [1, 1]} : vector<8x384xf32> to vector<8x128xf32>
    %146 = arith.addf %144, %145 : vector<8x128xf32>
    %147 = arith.negf %146 : vector<8x128xf32>
    %148 = math.exp %147 : vector<8x128xf32>
    %cst_38 = arith.constant 1.000000e+00 : f32
    %149 = vector.broadcast %cst_38 : f32 to vector<8x128xf32>
    %150 = arith.addf %149, %148 : vector<8x128xf32>
    %151 = arith.divf %149, %150 : vector<8x128xf32>
    %152 = vector.extract_strided_slice %131 {offsets = [2, 0, 0], sizes = [1, 8, 128], strides = [1, 1, 1]} : vector<3x8x128xf32> to vector<1x8x128xf32>
    %153 = vector.shape_cast %152 : vector<1x8x128xf32> to vector<8x128xf32>
    %154 = vector.extract_strided_slice %133 {offsets = [0, 256], sizes = [8, 128], strides = [1, 1]} : vector<8x384xf32> to vector<8x128xf32>
    %155 = arith.addf %154, %6 : vector<8x128xf32>
    %156 = arith.mulf %142, %155 : vector<8x128xf32>
    %157 = arith.addf %153, %156 : vector<8x128xf32>
    %158 = math.tanh %157 : vector<8x128xf32>
    %cst_39 = arith.constant 1.000000e+00 : f32
    %159 = vector.broadcast %cst_39 : f32 to vector<8x128xf32>
    %160 = arith.subf %159, %151 : vector<8x128xf32>
    %161 = arith.mulf %160, %158 : vector<8x128xf32>
    %162 = arith.mulf %151, %123 : vector<8x128xf32>
    %163 = arith.addf %161, %162 : vector<8x128xf32>
    %164 = arith.index_cast %c3_i32 : i32 to index
    %c0_40 = arith.constant 0 : index
    %c0_41 = arith.constant 0 : index
    %165 = vector.load %arg6[%164, %c0_40, %c0_41] : memref<8x8x128xf32, #tpu.memory_space<vmem>>, vector<1x8x128xf32>
    %166 = vector.shape_cast %165 : vector<1x8x128xf32> to vector<8x128xf32>
    %167 = vector.shape_cast %163 : vector<8x128xf32> to vector<1x8x128xf32>
    tpu.vector_store %arg6[%164, %c0_40, %c0_41], %167 {strides = array<i32>} : memref<8x8x128xf32, #tpu.memory_space<vmem>>, vector<1x8x128xf32>,
    %c4_i32 = arith.constant 4 : i32
    %168 = arith.index_cast %c4_i32 : i32 to index
    %c0_42 = arith.constant 0 : index
    %c0_43 = arith.constant 0 : index
    %c0_44 = arith.constant 0 : index
    %169 = vector.load %arg2[%168, %c0_42, %c0_43, %c0_44] : memref<8x3x8x128xbf16, #tpu.memory_space<vmem>>, vector<1x3x8x128xbf16>
    %170 = vector.shape_cast %169 : vector<1x3x8x128xbf16> to vector<3x8x128xbf16>
    %171 = arith.extf %170 : vector<3x8x128xbf16> to vector<3x8x128xf32>
    %172 = arith.truncf %163 : vector<8x128xf32> to vector<8x128xbf16>
    %cst_45 = arith.constant dense<0.000000e+00> : vector<8x384xf32>
    %173 = tpu.matmul %172, %3, %cst_45 {dimension_numbers = #tpu.dot_dimension_numbers<[1], [0], [0], [1], [0, 0, 1, 1], [], []>} : vector<8x128xbf16>, vector<128x384xbf16>, vector<8x384xf32> -> vector<8x384xf32>
    %174 = vector.extract_strided_slice %171 {offsets = [0, 0, 0], sizes = [1, 8, 128], strides = [1, 1, 1]} : vector<3x8x128xf32> to vector<1x8x128xf32>
    %175 = vector.shape_cast %174 : vector<1x8x128xf32> to vector<8x128xf32>
    %176 = vector.extract_strided_slice %173 {offsets = [0, 0], sizes = [8, 128], strides = [1, 1]} : vector<8x384xf32> to vector<8x128xf32>
    %177 = arith.addf %175, %176 : vector<8x128xf32>
    %178 = arith.negf %177 : vector<8x128xf32>
    %179 = math.exp %178 : vector<8x128xf32>
    %cst_46 = arith.constant 1.000000e+00 : f32
    %180 = vector.broadcast %cst_46 : f32 to vector<8x128xf32>
    %181 = arith.addf %180, %179 : vector<8x128xf32>
    %182 = arith.divf %180, %181 : vector<8x128xf32>
    %183 = vector.extract_strided_slice %171 {offsets = [1, 0, 0], sizes = [1, 8, 128], strides = [1, 1, 1]} : vector<3x8x128xf32> to vector<1x8x128xf32>
    %184 = vector.shape_cast %183 : vector<1x8x128xf32> to vector<8x128xf32>
    %185 = vector.extract_strided_slice %173 {offsets = [0, 128], sizes = [8, 128], strides = [1, 1]} : vector<8x384xf32> to vector<8x128xf32>
    %186 = arith.addf %184, %185 : vector<8x128xf32>
    %187 = arith.negf %186 : vector<8x128xf32>
    %188 = math.exp %187 : vector<8x128xf32>
    %cst_47 = arith.constant 1.000000e+00 : f32
    %189 = vector.broadcast %cst_47 : f32 to vector<8x128xf32>
    %190 = arith.addf %189, %188 : vector<8x128xf32>
    %191 = arith.divf %189, %190 : vector<8x128xf32>
    %192 = vector.extract_strided_slice %171 {offsets = [2, 0, 0], sizes = [1, 8, 128], strides = [1, 1, 1]} : vector<3x8x128xf32> to vector<1x8x128xf32>
    %193 = vector.shape_cast %192 : vector<1x8x128xf32> to vector<8x128xf32>
    %194 = vector.extract_strided_slice %173 {offsets = [0, 256], sizes = [8, 128], strides = [1, 1]} : vector<8x384xf32> to vector<8x128xf32>
    %195 = arith.addf %194, %6 : vector<8x128xf32>
    %196 = arith.mulf %182, %195 : vector<8x128xf32>
    %197 = arith.addf %193, %196 : vector<8x128xf32>
    %198 = math.tanh %197 : vector<8x128xf32>
    %cst_48 = arith.constant 1.000000e+00 : f32
    %199 = vector.broadcast %cst_48 : f32 to vector<8x128xf32>
    %200 = arith.subf %199, %191 : vector<8x128xf32>
    %201 = arith.mulf %200, %198 : vector<8x128xf32>
    %202 = arith.mulf %191, %163 : vector<8x128xf32>
    %203 = arith.addf %201, %202 : vector<8x128xf32>
    %204 = arith.index_cast %c4_i32 : i32 to index
    %c0_49 = arith.constant 0 : index
    %c0_50 = arith.constant 0 : index
    %205 = vector.load %arg6[%204, %c0_49, %c0_50] : memref<8x8x128xf32, #tpu.memory_space<vmem>>, vector<1x8x128xf32>
    %206 = vector.shape_cast %205 : vector<1x8x128xf32> to vector<8x128xf32>
    %207 = vector.shape_cast %203 : vector<8x128xf32> to vector<1x8x128xf32>
    tpu.vector_store %arg6[%204, %c0_49, %c0_50], %207 {strides = array<i32>} : memref<8x8x128xf32, #tpu.memory_space<vmem>>, vector<1x8x128xf32>,
    %c5_i32 = arith.constant 5 : i32
    %208 = arith.index_cast %c5_i32 : i32 to index
    %c0_51 = arith.constant 0 : index
    %c0_52 = arith.constant 0 : index
    %c0_53 = arith.constant 0 : index
    %209 = vector.load %arg2[%208, %c0_51, %c0_52, %c0_53] : memref<8x3x8x128xbf16, #tpu.memory_space<vmem>>, vector<1x3x8x128xbf16>
    %210 = vector.shape_cast %209 : vector<1x3x8x128xbf16> to vector<3x8x128xbf16>
    %211 = arith.extf %210 : vector<3x8x128xbf16> to vector<3x8x128xf32>
    %212 = arith.truncf %203 : vector<8x128xf32> to vector<8x128xbf16>
    %cst_54 = arith.constant dense<0.000000e+00> : vector<8x384xf32>
    %213 = tpu.matmul %212, %3, %cst_54 {dimension_numbers = #tpu.dot_dimension_numbers<[1], [0], [0], [1], [0, 0, 1, 1], [], []>} : vector<8x128xbf16>, vector<128x384xbf16>, vector<8x384xf32> -> vector<8x384xf32>
    %214 = vector.extract_strided_slice %211 {offsets = [0, 0, 0], sizes = [1, 8, 128], strides = [1, 1, 1]} : vector<3x8x128xf32> to vector<1x8x128xf32>
    %215 = vector.shape_cast %214 : vector<1x8x128xf32> to vector<8x128xf32>
    %216 = vector.extract_strided_slice %213 {offsets = [0, 0], sizes = [8, 128], strides = [1, 1]} : vector<8x384xf32> to vector<8x128xf32>
    %217 = arith.addf %215, %216 : vector<8x128xf32>
    %218 = arith.negf %217 : vector<8x128xf32>
    %219 = math.exp %218 : vector<8x128xf32>
    %cst_55 = arith.constant 1.000000e+00 : f32
    %220 = vector.broadcast %cst_55 : f32 to vector<8x128xf32>
    %221 = arith.addf %220, %219 : vector<8x128xf32>
    %222 = arith.divf %220, %221 : vector<8x128xf32>
    %223 = vector.extract_strided_slice %211 {offsets = [1, 0, 0], sizes = [1, 8, 128], strides = [1, 1, 1]} : vector<3x8x128xf32> to vector<1x8x128xf32>
    %224 = vector.shape_cast %223 : vector<1x8x128xf32> to vector<8x128xf32>
    %225 = vector.extract_strided_slice %213 {offsets = [0, 128], sizes = [8, 128], strides = [1, 1]} : vector<8x384xf32> to vector<8x128xf32>
    %226 = arith.addf %224, %225 : vector<8x128xf32>
    %227 = arith.negf %226 : vector<8x128xf32>
    %228 = math.exp %227 : vector<8x128xf32>
    %cst_56 = arith.constant 1.000000e+00 : f32
    %229 = vector.broadcast %cst_56 : f32 to vector<8x128xf32>
    %230 = arith.addf %229, %228 : vector<8x128xf32>
    %231 = arith.divf %229, %230 : vector<8x128xf32>
    %232 = vector.extract_strided_slice %211 {offsets = [2, 0, 0], sizes = [1, 8, 128], strides = [1, 1, 1]} : vector<3x8x128xf32> to vector<1x8x128xf32>
    %233 = vector.shape_cast %232 : vector<1x8x128xf32> to vector<8x128xf32>
    %234 = vector.extract_strided_slice %213 {offsets = [0, 256], sizes = [8, 128], strides = [1, 1]} : vector<8x384xf32> to vector<8x128xf32>
    %235 = arith.addf %234, %6 : vector<8x128xf32>
    %236 = arith.mulf %222, %235 : vector<8x128xf32>
    %237 = arith.addf %233, %236 : vector<8x128xf32>
    %238 = math.tanh %237 : vector<8x128xf32>
    %cst_57 = arith.constant 1.000000e+00 : f32
    %239 = vector.broadcast %cst_57 : f32 to vector<8x128xf32>
    %240 = arith.subf %239, %231 : vector<8x128xf32>
    %241 = arith.mulf %240, %238 : vector<8x128xf32>
    %242 = arith.mulf %231, %203 : vector<8x128xf32>
    %243 = arith.addf %241, %242 : vector<8x128xf32>
    %244 = arith.index_cast %c5_i32 : i32 to index
    %c0_58 = arith.constant 0 : index
    %c0_59 = arith.constant 0 : index
    %245 = vector.load %arg6[%244, %c0_58, %c0_59] : memref<8x8x128xf32, #tpu.memory_space<vmem>>, vector<1x8x128xf32>
    %246 = vector.shape_cast %245 : vector<1x8x128xf32> to vector<8x128xf32>
    %247 = vector.shape_cast %243 : vector<8x128xf32> to vector<1x8x128xf32>
    tpu.vector_store %arg6[%244, %c0_58, %c0_59], %247 {strides = array<i32>} : memref<8x8x128xf32, #tpu.memory_space<vmem>>, vector<1x8x128xf32>,
    %c6_i32 = arith.constant 6 : i32
    %248 = arith.index_cast %c6_i32 : i32 to index
    %c0_60 = arith.constant 0 : index
    %c0_61 = arith.constant 0 : index
    %c0_62 = arith.constant 0 : index
    %249 = vector.load %arg2[%248, %c0_60, %c0_61, %c0_62] : memref<8x3x8x128xbf16, #tpu.memory_space<vmem>>, vector<1x3x8x128xbf16>
    %250 = vector.shape_cast %249 : vector<1x3x8x128xbf16> to vector<3x8x128xbf16>
    %251 = arith.extf %250 : vector<3x8x128xbf16> to vector<3x8x128xf32>
    %252 = arith.truncf %243 : vector<8x128xf32> to vector<8x128xbf16>
    %cst_63 = arith.constant dense<0.000000e+00> : vector<8x384xf32>
    %253 = tpu.matmul %252, %3, %cst_63 {dimension_numbers = #tpu.dot_dimension_numbers<[1], [0], [0], [1], [0, 0, 1, 1], [], []>} : vector<8x128xbf16>, vector<128x384xbf16>, vector<8x384xf32> -> vector<8x384xf32>
    %254 = vector.extract_strided_slice %251 {offsets = [0, 0, 0], sizes = [1, 8, 128], strides = [1, 1, 1]} : vector<3x8x128xf32> to vector<1x8x128xf32>
    %255 = vector.shape_cast %254 : vector<1x8x128xf32> to vector<8x128xf32>
    %256 = vector.extract_strided_slice %253 {offsets = [0, 0], sizes = [8, 128], strides = [1, 1]} : vector<8x384xf32> to vector<8x128xf32>
    %257 = arith.addf %255, %256 : vector<8x128xf32>
    %258 = arith.negf %257 : vector<8x128xf32>
    %259 = math.exp %258 : vector<8x128xf32>
    %cst_64 = arith.constant 1.000000e+00 : f32
    %260 = vector.broadcast %cst_64 : f32 to vector<8x128xf32>
    %261 = arith.addf %260, %259 : vector<8x128xf32>
    %262 = arith.divf %260, %261 : vector<8x128xf32>
    %263 = vector.extract_strided_slice %251 {offsets = [1, 0, 0], sizes = [1, 8, 128], strides = [1, 1, 1]} : vector<3x8x128xf32> to vector<1x8x128xf32>
    %264 = vector.shape_cast %263 : vector<1x8x128xf32> to vector<8x128xf32>
    %265 = vector.extract_strided_slice %253 {offsets = [0, 128], sizes = [8, 128], strides = [1, 1]} : vector<8x384xf32> to vector<8x128xf32>
    %266 = arith.addf %264, %265 : vector<8x128xf32>
    %267 = arith.negf %266 : vector<8x128xf32>
    %268 = math.exp %267 : vector<8x128xf32>
    %cst_65 = arith.constant 1.000000e+00 : f32
    %269 = vector.broadcast %cst_65 : f32 to vector<8x128xf32>
    %270 = arith.addf %269, %268 : vector<8x128xf32>
    %271 = arith.divf %269, %270 : vector<8x128xf32>
    %272 = vector.extract_strided_slice %251 {offsets = [2, 0, 0], sizes = [1, 8, 128], strides = [1, 1, 1]} : vector<3x8x128xf32> to vector<1x8x128xf32>
    %273 = vector.shape_cast %272 : vector<1x8x128xf32> to vector<8x128xf32>
    %274 = vector.extract_strided_slice %253 {offsets = [0, 256], sizes = [8, 128], strides = [1, 1]} : vector<8x384xf32> to vector<8x128xf32>
    %275 = arith.addf %274, %6 : vector<8x128xf32>
    %276 = arith.mulf %262, %275 : vector<8x128xf32>
    %277 = arith.addf %273, %276 : vector<8x128xf32>
    %278 = math.tanh %277 : vector<8x128xf32>
    %cst_66 = arith.constant 1.000000e+00 : f32
    %279 = vector.broadcast %cst_66 : f32 to vector<8x128xf32>
    %280 = arith.subf %279, %271 : vector<8x128xf32>
    %281 = arith.mulf %280, %278 : vector<8x128xf32>
    %282 = arith.mulf %271, %243 : vector<8x128xf32>
    %283 = arith.addf %281, %282 : vector<8x128xf32>
    %284 = arith.index_cast %c6_i32 : i32 to index
    %c0_67 = arith.constant 0 : index
    %c0_68 = arith.constant 0 : index
    %285 = vector.load %arg6[%284, %c0_67, %c0_68] : memref<8x8x128xf32, #tpu.memory_space<vmem>>, vector<1x8x128xf32>
    %286 = vector.shape_cast %285 : vector<1x8x128xf32> to vector<8x128xf32>
    %287 = vector.shape_cast %283 : vector<8x128xf32> to vector<1x8x128xf32>
    tpu.vector_store %arg6[%284, %c0_67, %c0_68], %287 {strides = array<i32>} : memref<8x8x128xf32, #tpu.memory_space<vmem>>, vector<1x8x128xf32>,
    %c7_i32 = arith.constant 7 : i32
    %288 = arith.index_cast %c7_i32 : i32 to index
    %c0_69 = arith.constant 0 : index
    %c0_70 = arith.constant 0 : index
    %c0_71 = arith.constant 0 : index
    %289 = vector.load %arg2[%288, %c0_69, %c0_70, %c0_71] : memref<8x3x8x128xbf16, #tpu.memory_space<vmem>>, vector<1x3x8x128xbf16>
    %290 = vector.shape_cast %289 : vector<1x3x8x128xbf16> to vector<3x8x128xbf16>
    %291 = arith.extf %290 : vector<3x8x128xbf16> to vector<3x8x128xf32>
    %292 = arith.truncf %283 : vector<8x128xf32> to vector<8x128xbf16>
    %cst_72 = arith.constant dense<0.000000e+00> : vector<8x384xf32>
    %293 = tpu.matmul %292, %3, %cst_72 {dimension_numbers = #tpu.dot_dimension_numbers<[1], [0], [0], [1], [0, 0, 1, 1], [], []>} : vector<8x128xbf16>, vector<128x384xbf16>, vector<8x384xf32> -> vector<8x384xf32>
    %294 = vector.extract_strided_slice %291 {offsets = [0, 0, 0], sizes = [1, 8, 128], strides = [1, 1, 1]} : vector<3x8x128xf32> to vector<1x8x128xf32>
    %295 = vector.shape_cast %294 : vector<1x8x128xf32> to vector<8x128xf32>
    %296 = vector.extract_strided_slice %293 {offsets = [0, 0], sizes = [8, 128], strides = [1, 1]} : vector<8x384xf32> to vector<8x128xf32>
    %297 = arith.addf %295, %296 : vector<8x128xf32>
    %298 = arith.negf %297 : vector<8x128xf32>
    %299 = math.exp %298 : vector<8x128xf32>
    %cst_73 = arith.constant 1.000000e+00 : f32
    %300 = vector.broadcast %cst_73 : f32 to vector<8x128xf32>
    %301 = arith.addf %300, %299 : vector<8x128xf32>
    %302 = arith.divf %300, %301 : vector<8x128xf32>
    %303 = vector.extract_strided_slice %291 {offsets = [1, 0, 0], sizes = [1, 8, 128], strides = [1, 1, 1]} : vector<3x8x128xf32> to vector<1x8x128xf32>
    %304 = vector.shape_cast %303 : vector<1x8x128xf32> to vector<8x128xf32>
    %305 = vector.extract_strided_slice %293 {offsets = [0, 128], sizes = [8, 128], strides = [1, 1]} : vector<8x384xf32> to vector<8x128xf32>
    %306 = arith.addf %304, %305 : vector<8x128xf32>
    %307 = arith.negf %306 : vector<8x128xf32>
    %308 = math.exp %307 : vector<8x128xf32>
    %cst_74 = arith.constant 1.000000e+00 : f32
    %309 = vector.broadcast %cst_74 : f32 to vector<8x128xf32>
    %310 = arith.addf %309, %308 : vector<8x128xf32>
    %311 = arith.divf %309, %310 : vector<8x128xf32>
    %312 = vector.extract_strided_slice %291 {offsets = [2, 0, 0], sizes = [1, 8, 128], strides = [1, 1, 1]} : vector<3x8x128xf32> to vector<1x8x128xf32>
    %313 = vector.shape_cast %312 : vector<1x8x128xf32> to vector<8x128xf32>
    %314 = vector.extract_strided_slice %293 {offsets = [0, 256], sizes = [8, 128], strides = [1, 1]} : vector<8x384xf32> to vector<8x128xf32>
    %315 = arith.addf %314, %6 : vector<8x128xf32>
    %316 = arith.mulf %302, %315 : vector<8x128xf32>
    %317 = arith.addf %313, %316 : vector<8x128xf32>
    %318 = math.tanh %317 : vector<8x128xf32>
    %cst_75 = arith.constant 1.000000e+00 : f32
    %319 = vector.broadcast %cst_75 : f32 to vector<8x128xf32>
    %320 = arith.subf %319, %311 : vector<8x128xf32>
    %321 = arith.mulf %320, %318 : vector<8x128xf32>
    %322 = arith.mulf %311, %283 : vector<8x128xf32>
    %323 = arith.addf %321, %322 : vector<8x128xf32>
    %324 = arith.index_cast %c7_i32 : i32 to index
    %c0_76 = arith.constant 0 : index
    %c0_77 = arith.constant 0 : index
    %325 = vector.load %arg6[%324, %c0_76, %c0_77] : memref<8x8x128xf32, #tpu.memory_space<vmem>>, vector<1x8x128xf32>
    %326 = vector.shape_cast %325 : vector<1x8x128xf32> to vector<8x128xf32>
    %327 = vector.shape_cast %323 : vector<8x128xf32> to vector<1x8x128xf32>
    tpu.vector_store %arg6[%324, %c0_76, %c0_77], %327 {strides = array<i32>} : memref<8x8x128xf32, #tpu.memory_space<vmem>>, vector<1x8x128xf32>,
    %c8_i32 = arith.constant 8 : i32
    %c0_78 = arith.constant 0 : index
    %c0_79 = arith.constant 0 : index
    %328 = vector.load %arg7[%c0_78, %c0_79] : memref<8x128xf32, #tpu.memory_space<vmem>>, vector<8x128xf32>
    tpu.vector_store %arg7[%c0_78, %c0_79], %323 {strides = array<i32>} : memref<8x128xf32, #tpu.memory_space<vmem>>, vector<8x128xf32>,
    return
  }
  func.func @transform_0(%arg0: i32, %arg1: i32) -> (i32, i32, i32, i32) {
    %c0_i32 = arith.constant 0 : i32
    %c0_i32_0 = arith.constant 0 : i32
    %c0_i32_1 = arith.constant 0 : i32
    return %arg1, %c0_i32, %arg0, %c0_i32_0 : i32, i32, i32, i32
  }
  func.func @transform_1(%arg0: i32, %arg1: i32) -> (i32, i32) {
    %c0_i32 = arith.constant 0 : i32
    %c0_i32_0 = arith.constant 0 : i32
    return %arg0, %c0_i32 : i32, i32
  }
  func.func @transform_2(%arg0: i32, %arg1: i32) -> (i32, i32) {
    %c0_i32 = arith.constant 0 : i32
    %c0_i32_0 = arith.constant 0 : i32
    %c0_i32_1 = arith.constant 0 : i32
    return %c0_i32, %c0_i32_0 : i32, i32
  }
  func.func @transform_3(%arg0: i32, %arg1: i32) -> (i32, i32) {
    %c0_i32 = arith.constant 0 : i32
    %c0_i32_0 = arith.constant 0 : i32
    %c0_i32_1 = arith.constant 0 : i32
    return %c0_i32, %c0_i32_0 : i32, i32
  }
  func.func @transform_4(%arg0: i32, %arg1: i32) -> (i32, i32, i32) {
    %c0_i32 = arith.constant 0 : i32
    %c0_i32_0 = arith.constant 0 : i32
    return %arg1, %arg0, %c0_i32 : i32, i32, i32
  }
  func.func @transform_5(%arg0: i32, %arg1: i32) -> (i32, i32) {
    %c0_i32 = arith.constant 0 : i32
    %c0_i32_0 = arith.constant 0 : i32
    return %arg0, %c0_i32 : i32, i32
  }
}

</mosaic_0001>

<bundles_post_ra>
// kernel: tpu_custom_call.1
= control target key start
LH: loop header
LB: loop body
LE: loop exit
PB: predicated region body
PF: predicated region fallthrough
CT: control target
= control target key end

     0   :  { %11 = vsyncpa [#allocation3], 0  ;;  %s2154_s0 = inlined_call_operand.hbm [shape: bf16[8,3,8,128], index: 0, kind: input, shape index: {}]   ;;  %s2155_s1 = inlined_call_operand.hbm [shape: f32[8,128], index: 1, kind: input, shape index: {}]   ;;  %s2156_s2 = inlined_call_operand.hbm [shape: bf16[128,384], index: 2, kind: input, shape index: {}]   ;;  %s2157_s3 = inlined_call_operand.vmem [shape: f32[1,128], index: 3, kind: input, shape index: {}]   ;;  %s2158_s4 = inlined_call_operand.hbm [shape: f32[8,8,128], index: 4, kind: output, shape index: {0}]   ;;  %s2159_s5 = inlined_call_operand.hbm [shape: f32[8,128], index: 5, kind: output, shape index: {1}]  }
   0x1   :  { %12 = vsyncpa [#allocation6], 0 }
   0x2   :  { %13 = vsyncpa [#allocation4], 0 }
   0x3   :  { %14 = vsyncpa [#allocation10], 0  ;;  %s1721_s18 = smov [#allocation5]   ;;  %s1722_s20 = smov [#allocation2]  }
   0x4   :  { %s33_s19 = sshll.u32 %s1721_s18, 4  ;;  %s20_s21 = sshll.u32 %s1722_s20, 4  ;;  %s34_s19 = int_to_ptr.vmem [resolvable:$true] %s33_s19  ;;  %s21_s21 = int_to_ptr.vmem [resolvable:$true] %s20_s21 }
   0x5   :  { %s1621_s22 = scalar_lea.vmem %s34_s19, 128  ;;  %p1626_p1 = scmp.lt.s32.totalorder %s34_s19, %s34_s19 }
   0x6   :  { %p1622_p0 = scmp.ne.s32.totalorder %s34_s19, %s1621_s22  ;;  %p1627_p2 = scmp.lt.s32.totalorder %s1621_s22, %s1621_s22 }
   0x8   :  { %p1628_p3 = por %p1627_p2, %p1626_p1 }
   0xa   :  { %p1629_p4 = pnand %p1628_p3, %p1622_p0 }
   0xc   :  { %1632 = shalt.err (!%p1629_p4)
}
   0xd   :  { %36 = dma.hbm_to_vmem [thread:$0]  %s2155_s1, 128, %s34_s19, [#allocation6]  }
   0xe   :  { %s1641_s25 = scalar_lea.vmem %s21_s21, 1536  ;;  %p1646_p6 = scmp.lt.s32.totalorder %s21_s21, %s21_s21 }
   0xf   :  { %p1642_p5 = scmp.ne.s32.totalorder %s21_s21, %s1641_s25  ;;  %p1647_p7 = scmp.lt.s32.totalorder %s1641_s25, %s1641_s25 }
  0x11   :  { %p1648_p8 = por %p1647_p7, %p1646_p6 }
  0x13   :  { %p1649_p9 = pnand %p1648_p8, %p1642_p5 }
  0x15   :  { %1652 = shalt.err (!%p1649_p9)
}
  0x16   :  { %s1723_s26 = smov 64   ;;  %s1724_s27 = smov 4  }
  0x17   :  { %26 = dma.hbm_to_vmem [thread:$0]  %s2154_s0, 1536, %s21_s21, [#allocation3], %s1723_s26, %s1723_s26, %s1724_s27  }
  0x18   :  { %s1725_s30 = smov [#allocation7]  }
  0x19   :  { %s42_s6 = sshll.u32 %s1725_s30, 4  ;;  %s43_s6 = int_to_ptr.vmem [resolvable:$true] %s42_s6 }
  0x1a   :  { %s1661_s7 = scalar_lea.vmem %s43_s6, 3072  ;;  %p1666_p11 = scmp.lt.s32.totalorder %s43_s6, %s43_s6 }
  0x1b   :  { %p1662_p10 = scmp.ne.s32.totalorder %s43_s6, %s1661_s7  ;;  %p1667_p12 = scmp.lt.s32.totalorder %s1661_s7, %s1661_s7 }
  0x1d   :  { %p1668_p13 = por %p1667_p12, %p1666_p11 }
  0x1f   :  { %p1669_p0 = pnand %p1668_p13, %p1662_p10 }
  0x21   :  { %1672 = shalt.err (!%p1669_p0)
}
  0x22   :  { %s1726_s1 = smov 192   ;;  %s1727_s8 = smov 12  }
  0x23   :  { %48 = dma.hbm_to_vmem [thread:$0]  %s2156_s2, 3072, %s43_s6, [#allocation6], %s1726_s1, %s1726_s1, %s1727_s8  }
  0x24   :  { %1713 = dma.done.wait [#allocation3], 1536  }
  0x25   :  { %1714 = vsyncadd [#allocation3], 4294965760 }
  0x26   :  { %1715 = dma.done.wait [#allocation6], 3200  }
  0x27   :  { %1716 = vsyncadd [#allocation6], 4294964096  ;;  %v1728_v0 = vmov 0.0   ;;  %v1729_v1 = vmov 0   ;;  %vm1730_vm0 = vmmov 0   ;;  %v1842_v23 = vld [vmem:[#allocation5] sm:$0xff] }
  0x28   :  { %1319 = vmatprep.subr.bf16.mxu1 %v1728_v0  ;;  %274 = vmatprep.mubr.bf16.mxu0 %v1729_v1  ;;  %v1778_v2 = vld [vmem:[#allocation7 + $0xac] ss:$12 sps:$4 sm:$0xff]   ;;  %v1780_v3 = vld [vmem:[#allocation7 + $0xa8] ss:$12 sps:$4 sm:$0xff]   ;;  %v1786_v5 = vld [vmem:[#allocation7 + $0x90] ss:$12 sps:$4 sm:$0xff]   ;;  %v113_v25 = vpack.c.bf16 %v1842_v23, %v1842_v23 }
  0x29   :  { %1335 = vmatprep.mubr.msk.bf16.mxu1 %vm1730_vm0, %v1728_v0  ;;  %242 = vmatprep.subr.bf16.mxu0 %v1778_v2  ;;  %v1783_v4 = vld [vmem:[#allocation7 + $0x94] ss:$12 sps:$4 sm:$0xff]   ;;  %v1789_v6 = vld [vmem:[#allocation7 + $0x7c] ss:$12 sps:$4 sm:$0xff]   ;;  %v1792_v7 = vld [vmem:[#allocation7 + $0x78] ss:$12 sps:$4 sm:$0xff]  }
  0x2a   :  { %243 = vmatpush1.bf16.msra.mxu0 %v1780_v3  ;;  %v1795_v8 = vld [vmem:[#allocation7 + $0x64] ss:$12 sps:$4 sm:$0xff]   ;;  %v1800_v10 = vld [vmem:[#allocation7 + $0x60] ss:$12 sps:$4 sm:$0xff]   ;;  %v1809_v13 = vld [vmem:[#allocation7 + $0x48] ss:$12 sps:$4 sm:$0xff]  }
  0x2b   :  { %244 = vmatprep.subr.bf16.mxu0 %v1783_v4  ;;  %v1797_v9 = vld [vmem:[#allocation7 + $0xb0] ss:$12 sps:$4 sm:$0xff]   ;;  %v1803_v11 = vld [vmem:[#allocation7 + $0x4c] ss:$12 sps:$4 sm:$0xff]   ;;  %v1812_v14 = vld [vmem:[#allocation7 + $0x34] ss:$12 sps:$4 sm:$0xff]  }
  0x2c   :  { %1320 = vmatpush3.bf16.msra.mxu1 %v1797_v9  ;;  %v1806_v12 = vld [vmem:[#allocation7 + $0x98] ss:$12 sps:$4 sm:$0xff]   ;;  %v1816_v15 = vld [vmem:[#allocation7 + $0x80] ss:$12 sps:$4 sm:$0xff]   ;;  %v1820_v16 = vld [vmem:[#allocation7 + $0x30] ss:$12 sps:$4 sm:$0xff]  }
  0x2d   :  { %1321 = vmatprep.subr.bf16.mxu1 %v1728_v0  ;;  %v1823_v17 = vld [vmem:[#allocation7 + $0x1c] ss:$12 sps:$4 sm:$0xff]   ;;  %v1830_v19 = vld [vmem:[#allocation7 + $0x18] ss:$12 sps:$4 sm:$0xff]   ;;  %v1840_v22 = vld [vmem:[#allocation7] ss:$12 sps:$4 sm:$0xff]  }
  0x2e   :  { %245 = vmatpush1.bf16.msra.mxu0 %v1786_v5  ;;  %v1826_v18 = vld [vmem:[#allocation7 + $0x68] ss:$12 sps:$4 sm:$0xff]   ;;  %v1833_v20 = vld [vmem:[#allocation7 + $0x4] ss:$12 sps:$4 sm:$0xff]   ;;  %v1853_v26 = vld [vmem:[#allocation7 + $0x20] ss:$12 sps:$4 sm:$0xff]  }
  0x2f   :  { %246 = vmatprep.subr.bf16.mxu0 %v1789_v6  ;;  %v1836_v21 = vld [vmem:[#allocation7 + $0x50] ss:$12 sps:$4 sm:$0xff]   ;;  %v1846_v24 = vld [vmem:[#allocation7 + $0x38] ss:$12 sps:$4 sm:$0xff]   ;;  %v1860_v27 = vld [vmem:[#allocation7 + $0x8] ss:$12 sps:$4 sm:$0xff]  }
  0x30   :  { %1322 = vmatpush3.bf16.msra.mxu1 %v1806_v12  ;;  %v1212_v28 = vld [vmem:[#allocation2] sm:$0xff]   ;;  %v109_v47 = vld [vmem:[#allocation2 + $0x8] sm:$0xff]   ;;  %s1732_s12 = smov [#allocation9]  }
  0x31   :  { %1323 = vmatprep.subr.bf16.mxu1 %v1728_v0  ;;  %v1213_v29 = vunpack.c.l.bf16 %v1212_v28  ;;  %v1214_v34 = vunpack.c.h.bf16 %v1212_v28  ;;  %v1901_v46 = vld [vmem:[%s2157_s3] ss:$0 sm:$0xff]  ;;  %v112_v50 = vunpack.c.l.bf16 %v109_v47  ;;  %v350_v61 = vunpack.c.h.bf16 %v109_v47  ;;  %s1731_s3 = smov [#allocation8]   ;;  %s1156_s13 = sshll.u32 %s1732_s12, 4  ;;  %s1157_s13 = int_to_ptr.vmem [resolvable:$true] %s1156_s13 }
  0x32   :  { %247 = vmatpush1.bf16.msra.mxu0 %v1792_v7  ;;  %s1143_s11 = sshll.u32 %s1731_s3, 4  ;;  %s1144_s11 = int_to_ptr.vmem [resolvable:$true] %s1143_s11 }
  0x33   :  { %248 = vmatprep.subr.bf16.mxu0 %v1795_v8  ;;  %s1673_s14 = scalar_lea.vmem %s1144_s11, 1024  ;;  %p1678_p2 = scmp.lt.s32.totalorder %s1144_s11, %s1144_s11 }
  0x34   :  { %1324 = vmatpush3.bf16.msra.mxu1 %v1816_v15  ;;  %p1674_p1 = scmp.ne.s32.totalorder %s1144_s11, %s1673_s14  ;;  %p1679_p3 = scmp.lt.s32.totalorder %s1673_s14, %s1673_s14 }
  0x35   :  { %1325 = vmatprep.subr.bf16.mxu1 %v1728_v0 }
  0x36   :  { %249 = vmatpush1.bf16.msra.mxu0 %v1800_v10  ;;  %p1680_p4 = por %p1679_p3, %p1678_p2 }
  0x37   :  { %250 = vmatprep.subr.bf16.mxu0 %v1803_v11 }
  0x38   :  { %1326 = vmatpush3.bf16.msra.mxu1 %v1826_v18  ;;  %p1681_p5 = pnand %p1680_p4, %p1674_p1 }
  0x39   :  { %1327 = vmatprep.subr.bf16.mxu1 %v1728_v0 }
  0x3a   :  { %251 = vmatpush1.bf16.msra.mxu0 %v1809_v13 }
  0x3b   :  { %252 = vmatprep.subr.bf16.mxu0 %v1812_v14 }
  0x3c   :  { %1328 = vmatpush3.bf16.msra.mxu1 %v1836_v21 }
  0x3d   :  { %1329 = vmatprep.subr.bf16.mxu1 %v1728_v0 }
  0x3e   :  { %253 = vmatpush1.bf16.msra.mxu0 %v1820_v16 }
  0x3f   :  { %254 = vmatprep.subr.bf16.mxu0 %v1823_v17 }
  0x40   :  { %1330 = vmatpush3.bf16.msra.mxu1 %v1846_v24 }
  0x41   :  { %1331 = vmatprep.subr.bf16.mxu1 %v1728_v0 }
  0x42   :  { %255 = vmatpush1.bf16.msra.mxu0 %v1830_v19 }
  0x43   :  { %256 = vmatprep.subr.bf16.mxu0 %v1833_v20 }
  0x44   :  { %1332 = vmatpush3.bf16.msra.mxu1 %v1853_v26 }
  0x45   :  { %1333 = vmatprep.subr.bf16.mxu1 %v1728_v0 }
  0x46   :  { %257 = vmatpush1.bf16.msra.mxu0 %v1840_v22 }
  0x47   :  { %354 = vmatprep.subr.bf16.mxu0 %v1778_v2 }
  0x48   :  { %1334 = vmatpush3.bf16.msra.mxu1 %v1860_v27 }
  0x49   :  { %275 = vmatmul.mubr.bf16.vlgmr.msra.gmra.mxu0 %v113_v25  ;;  %1339 = vmatprep.subr.bf16.mxu1 %v1728_v0 }
  0x4a   :  { %355 = vmatpush1.bf16.msra.mxu0 %v1780_v3  ;;  %386 = vmatprep.mubr.bf16.mxu0 %v1729_v1 }
  0x4b   :  { %356 = vmatprep.subr.bf16.mxu0 %v1783_v4  ;;  %1336 = vmatmul.mubr.bf16.vlgmr.msra.gmra.mxu1 %v113_v25 }
  0x4c   :  { %1340 = vmatpush3.bf16.msra.mxu1 %v1797_v9  ;;  %1355 = vmatprep.mubr.msk.bf16.mxu1 %vm1730_vm0, %v1728_v0 }
  0x4d   :  { %1341 = vmatprep.subr.bf16.mxu1 %v1728_v0 }
  0x4e   :  { %357 = vmatpush1.bf16.msra.mxu0 %v1786_v5 }
  0x4f   :  { %358 = vmatprep.subr.bf16.mxu0 %v1789_v6 }
  0x50   :  { %1342 = vmatpush3.bf16.msra.mxu1 %v1806_v12 }
  0x51   :  { %1343 = vmatprep.subr.bf16.mxu1 %v1728_v0 }
  0x52   :  { %359 = vmatpush1.bf16.msra.mxu0 %v1792_v7 }
  0x53   :  { %360 = vmatprep.subr.bf16.mxu0 %v1795_v8 }
  0x54   :  { %1344 = vmatpush3.bf16.msra.mxu1 %v1816_v15 }
  0x55   :  { %1345 = vmatprep.subr.bf16.mxu1 %v1728_v0 }
  0x56   :  { %361 = vmatpush1.bf16.msra.mxu0 %v1800_v10 }
  0x57   :  { %362 = vmatprep.subr.bf16.mxu0 %v1803_v11 }
  0x58   :  { %1346 = vmatpush3.bf16.msra.mxu1 %v1826_v18 }
  0x59   :  { %1347 = vmatprep.subr.bf16.mxu1 %v1728_v0 }
  0x5a   :  { %363 = vmatpush1.bf16.msra.mxu0 %v1809_v13 }
  0x5b   :  { %364 = vmatprep.subr.bf16.mxu0 %v1812_v14 }
  0x5c   :  { %1348 = vmatpush3.bf16.msra.mxu1 %v1836_v21 }
  0x5d   :  { %1349 = vmatprep.subr.bf16.mxu1 %v1728_v0 }
  0x5e   :  { %365 = vmatpush1.bf16.msra.mxu0 %v1820_v16 }
  0x5f   :  { %366 = vmatprep.subr.bf16.mxu0 %v1823_v17 }
  0x60   :  { %1350 = vmatpush3.bf16.msra.mxu1 %v1846_v24 }
  0x61   :  { %1351 = vmatprep.subr.bf16.mxu1 %v1728_v0 }
  0x62   :  { %367 = vmatpush1.bf16.msra.mxu0 %v1830_v19 }
  0x63   :  { %368 = vmatprep.subr.bf16.mxu0 %v1833_v20 }
  0x64   :  { %1352 = vmatpush3.bf16.msra.mxu1 %v1853_v26 }
  0x65   :  { %1353 = vmatprep.subr.bf16.mxu1 %v1728_v0 }
  0x66   :  { %369 = vmatpush1.bf16.msra.mxu0 %v1840_v22 }
  0x67   :  { %467 = vmatprep.subr.bf16.mxu0 %v1778_v2 }
  0x68   :  { %1354 = vmatpush3.bf16.msra.mxu1 %v1860_v27 }
  0x69   :  { %1359 = vmatprep.subr.bf16.mxu1 %v1728_v0 }
 0x109   :  { %v276_v30 = vpop.f32.mrf.mxu0 }
 0x10a   :  { %v323_v31 = vadd.f32 %v1213_v29, %v276_v30 }
 0x10b   :  { %v278_v32 = vpop.f32.mrf.mxu0  ;;  %v317_v38 = vpop.f32.mrf.mxu1 }
 0x10c   :  { %v1195_v33 = vmul.f32 -1.442695, %v323_v31  ;;  %v330_v37 = vadd.f32 %v1214_v34, %v278_v32  ;;  %v337_v49 = vadd.f32 %v1901_v46, %v317_v38 }
 0x10d   :  { %v280_v35 = vpop.f32.mrf.mxu0  ;;  %v1337_v40 = vpop.f32.mrf.mxu1 }
 0x10e   :  { %1525 = vpow2.f32 %v1195_v33  ;;  %v1196_v39 = vmul.f32 -1.442695, %v330_v37 }
 0x10f   :  { %v281_v36 = vpop.f32.mrf.mxu0  ;;  %v320_v41 = vpop.f32.mrf.mxu1 }
 0x110   :  { %1527 = vpow2.f32 %v1196_v39 }
 0x111   :  { %v1338_v42 = vpop.f32.mrf.mxu1 }
 0x11b   :  { %v1526_v43 = vpop.eup %1525 }
 0x11c   :  { %v327_v44 = vadd.f32 1.0, %v1526_v43 }
 0x11d   :  { %v1528_v45 = vpop.eup %1527 }
 0x11e   :  { %1529 = vrcp.f32 %v327_v44  ;;  %v334_v48 = vadd.f32 1.0, %v1528_v45 }
 0x120   :  { %1531 = vrcp.f32 %v334_v48 }
 0x12b   :  { %v1530_v51 = vpop.eup %1529 }
 0x12c   :  { %v338_v52 = vmul.f32 %v1530_v51, %v337_v49 }
 0x12d   :  { %v1532_v54 = vpop.eup %1531 }
 0x12e   :  { %v339_v53 = vadd.f32 %v338_v52, %v112_v50  ;;  %v341_v55 = vsub.f32 1.0, %v1532_v54  ;;  %v343_v58 = vmul.f32 %v1532_v54, %v1842_v23  ;;  %v1243_v23 = vld [vmem:[#allocation2 + $0x10] sm:$0xff]  }
 0x12f   :  { %v1217_v31 = vunpack.c.l.bf16 %v1243_v23  ;;  %v1218_v43 = vunpack.c.h.bf16 %v1243_v23 }
 0x130   :  { %1533 = vtanh.f32 %v339_v53 }
 0x13d   :  { %v1534_v56 = vpop.eup %1533 }
 0x13e   :  { %v342_v57 = vmul.f32 %v1534_v56, %v341_v55  ;;  %v1220_v55 = vld [vmem:[#allocation2 + $0x18] sm:$0xff]  }
 0x13f   :  { %v1221_v56 = vunpack.c.l.bf16 %v1220_v55 }
 0x140   :  { %v1905_v59 = vadd.f32 %v343_v58, %v342_v57 }
 0x142   :  { %345 = vst [vmem:[#allocation8] sm:$0xff] %v1905_v59  ;;  %v353_v60 = vpack.c.bf16 %v1905_v59, %v1905_v59 }
 0x144   :  { %387 = vmatmul.mubr.bf16.vlgmr.msra.gmra.mxu0 %v353_v60  ;;  %1356 = vmatmul.mubr.bf16.vlgmr.msra.gmra.mxu1 %v353_v60 }
 0x145   :  { %468 = vmatpush1.bf16.msra.mxu0 %v1780_v3  ;;  %1360 = vmatpush3.bf16.msra.mxu1 %v1797_v9 }
 0x146   :  { %469 = vmatprep.subr.bf16.mxu0 %v1783_v4  ;;  %1361 = vmatprep.subr.bf16.mxu1 %v1728_v0 }
 0x147   :  { %499 = vmatprep.mubr.bf16.mxu0 %v1729_v1  ;;  %1375 = vmatprep.mubr.msk.bf16.mxu1 %vm1730_vm0, %v1728_v0 }
 0x149   :  { %470 = vmatpush1.bf16.msra.mxu0 %v1786_v5  ;;  %1362 = vmatpush3.bf16.msra.mxu1 %v1806_v12 }
 0x14a   :  { %471 = vmatprep.subr.bf16.mxu0 %v1789_v6  ;;  %1363 = vmatprep.subr.bf16.mxu1 %v1728_v0 }
 0x14d   :  { %472 = vmatpush1.bf16.msra.mxu0 %v1792_v7  ;;  %1364 = vmatpush3.bf16.msra.mxu1 %v1816_v15 }
 0x14e   :  { %473 = vmatprep.subr.bf16.mxu0 %v1795_v8  ;;  %1365 = vmatprep.subr.bf16.mxu1 %v1728_v0 }
 0x151   :  { %474 = vmatpush1.bf16.msra.mxu0 %v1800_v10  ;;  %1366 = vmatpush3.bf16.msra.mxu1 %v1826_v18 }
 0x152   :  { %475 = vmatprep.subr.bf16.mxu0 %v1803_v11  ;;  %1367 = vmatprep.subr.bf16.mxu1 %v1728_v0 }
 0x155   :  { %476 = vmatpush1.bf16.msra.mxu0 %v1809_v13  ;;  %1368 = vmatpush3.bf16.msra.mxu1 %v1836_v21 }
 0x156   :  { %477 = vmatprep.subr.bf16.mxu0 %v1812_v14  ;;  %1369 = vmatprep.subr.bf16.mxu1 %v1728_v0 }
 0x159   :  { %478 = vmatpush1.bf16.msra.mxu0 %v1820_v16  ;;  %1370 = vmatpush3.bf16.msra.mxu1 %v1846_v24 }
 0x15a   :  { %479 = vmatprep.subr.bf16.mxu0 %v1823_v17  ;;  %1371 = vmatprep.subr.bf16.mxu1 %v1728_v0 }
 0x15d   :  { %480 = vmatpush1.bf16.msra.mxu0 %v1830_v19  ;;  %1372 = vmatpush3.bf16.msra.mxu1 %v1853_v26 }
 0x15e   :  { %481 = vmatprep.subr.bf16.mxu0 %v1833_v20  ;;  %1373 = vmatprep.subr.bf16.mxu1 %v1728_v0 }
 0x161   :  { %482 = vmatpush1.bf16.msra.mxu0 %v1840_v22  ;;  %1374 = vmatpush3.bf16.msra.mxu1 %v1860_v27 }
 0x162   :  { %580 = vmatprep.subr.bf16.mxu0 %v1778_v2  ;;  %1379 = vmatprep.subr.bf16.mxu1 %v1728_v0 }
 0x204   :  { %v388_v62 = vpop.f32.mrf.mxu0  ;;  %v429_v63 = vpop.f32.mrf.mxu1 }
 0x205   :  { %v435_v25 = vadd.f32 %v388_v62, %v350_v61  ;;  %v449_v42 = vadd.f32 %v1901_v46, %v429_v63  ;;  %v1222_v63 = vunpack.c.h.bf16 %v1220_v55 }
 0x206   :  { %v390_v28 = vpop.f32.mrf.mxu0  ;;  %v1357_v29 = vpop.f32.mrf.mxu1 }
 0x207   :  { %v1197_v30 = vmul.f32 -1.442695, %v435_v25  ;;  %v442_v36 = vadd.f32 %v1217_v31, %v390_v28 }
 0x208   :  { %v392_v32 = vpop.f32.mrf.mxu0  ;;  %v432_v33 = vpop.f32.mrf.mxu1 }
 0x209   :  { %1535 = vpow2.f32 %v1197_v30  ;;  %v1198_v37 = vmul.f32 -1.442695, %v442_v36 }
 0x20a   :  { %v393_v34 = vpop.f32.mrf.mxu0  ;;  %v1358_v35 = vpop.f32.mrf.mxu1 }
 0x20b   :  { %1537 = vpow2.f32 %v1198_v37  ;;  %v462_v35 = vld [vmem:[#allocation2 + $0x20] sm:$0xff]  }
 0x20c   :  { %v465_v37 = vunpack.c.l.bf16 %v462_v35 }
 0x216   :  { %v1536_v38 = vpop.eup %1535 }
 0x217   :  { %v439_v39 = vadd.f32 1.0, %v1536_v38 }
 0x218   :  { %v1538_v40 = vpop.eup %1537 }
 0x219   :  { %1539 = vrcp.f32 %v439_v39  ;;  %v446_v41 = vadd.f32 1.0, %v1538_v40 }
 0x21b   :  { %1541 = vrcp.f32 %v446_v41 }
 0x226   :  { %v1540_v44 = vpop.eup %1539 }
 0x227   :  { %v450_v45 = vmul.f32 %v1540_v44, %v449_v42 }
 0x228   :  { %v1542_v48 = vpop.eup %1541 }
 0x229   :  { %v451_v47 = vadd.f32 %v1218_v43, %v450_v45  ;;  %v453_v49 = vsub.f32 1.0, %v1542_v48  ;;  %v455_v52 = vmul.f32 %v1542_v48, %v1905_v59 }
 0x22b   :  { %1543 = vtanh.f32 %v451_v47 }
 0x238   :  { %v1544_v50 = vpop.eup %1543 }
 0x239   :  { %v454_v51 = vmul.f32 %v1544_v50, %v453_v49  ;;  %v576_v50 = vunpack.c.h.bf16 %v462_v35 }
 0x23b   :  { %v1947_v53 = vadd.f32 %v455_v52, %v454_v51 }
 0x23d   :  { %458 = vst [vmem:[#allocation8 + $0x8] sm:$0xff] %v1947_v53  ;;  %v466_v54 = vpack.c.bf16 %v1947_v53, %v1947_v53 }
 0x23f   :  { %500 = vmatmul.mubr.bf16.vlgmr.msra.gmra.mxu0 %v466_v54  ;;  %1376 = vmatmul.mubr.bf16.vlgmr.msra.gmra.mxu1 %v466_v54 }
 0x240   :  { %581 = vmatpush1.bf16.msra.mxu0 %v1780_v3  ;;  %1380 = vmatpush3.bf16.msra.mxu1 %v1797_v9 }
 0x241   :  { %582 = vmatprep.subr.bf16.mxu0 %v1783_v4  ;;  %1381 = vmatprep.subr.bf16.mxu1 %v1728_v0 }
 0x242   :  { %612 = vmatprep.mubr.bf16.mxu0 %v1729_v1  ;;  %1395 = vmatprep.mubr.msk.bf16.mxu1 %vm1730_vm0, %v1728_v0 }
 0x244   :  { %583 = vmatpush1.bf16.msra.mxu0 %v1786_v5  ;;  %1382 = vmatpush3.bf16.msra.mxu1 %v1806_v12 }
 0x245   :  { %584 = vmatprep.subr.bf16.mxu0 %v1789_v6  ;;  %1383 = vmatprep.subr.bf16.mxu1 %v1728_v0 }
 0x248   :  { %585 = vmatpush1.bf16.msra.mxu0 %v1792_v7  ;;  %1384 = vmatpush3.bf16.msra.mxu1 %v1816_v15 }
 0x249   :  { %586 = vmatprep.subr.bf16.mxu0 %v1795_v8  ;;  %1385 = vmatprep.subr.bf16.mxu1 %v1728_v0 }
 0x24c   :  { %587 = vmatpush1.bf16.msra.mxu0 %v1800_v10  ;;  %1386 = vmatpush3.bf16.msra.mxu1 %v1826_v18 }
 0x24d   :  { %588 = vmatprep.subr.bf16.mxu0 %v1803_v11  ;;  %1387 = vmatprep.subr.bf16.mxu1 %v1728_v0 }
 0x250   :  { %589 = vmatpush1.bf16.msra.mxu0 %v1809_v13  ;;  %1388 = vmatpush3.bf16.msra.mxu1 %v1836_v21 }
 0x251   :  { %590 = vmatprep.subr.bf16.mxu0 %v1812_v14  ;;  %1389 = vmatprep.subr.bf16.mxu1 %v1728_v0 }
 0x254   :  { %591 = vmatpush1.bf16.msra.mxu0 %v1820_v16  ;;  %1390 = vmatpush3.bf16.msra.mxu1 %v1846_v24 }
 0x255   :  { %592 = vmatprep.subr.bf16.mxu0 %v1823_v17  ;;  %1391 = vmatprep.subr.bf16.mxu1 %v1728_v0 }
 0x258   :  { %593 = vmatpush1.bf16.msra.mxu0 %v1830_v19  ;;  %1392 = vmatpush3.bf16.msra.mxu1 %v1853_v26 }
 0x259   :  { %594 = vmatprep.subr.bf16.mxu0 %v1833_v20  ;;  %1393 = vmatprep.subr.bf16.mxu1 %v1728_v0 }
 0x25c   :  { %595 = vmatpush1.bf16.msra.mxu0 %v1840_v22  ;;  %1394 = vmatpush3.bf16.msra.mxu1 %v1860_v27 }
 0x25d   :  { %693 = vmatprep.subr.bf16.mxu0 %v1778_v2  ;;  %1399 = vmatprep.subr.bf16.mxu1 %v1728_v0 }
 0x2ff   :  { %v501_v57 = vpop.f32.mrf.mxu0  ;;  %v542_v58 = vpop.f32.mrf.mxu1 }
 0x300   :  { %v548_v59 = vadd.f32 %v1221_v56, %v501_v57  ;;  %v562_v38 = vadd.f32 %v1901_v46, %v542_v58 }
 0x301   :  { %v503_v60 = vpop.f32.mrf.mxu0  ;;  %v1377_v61 = vpop.f32.mrf.mxu1 }
 0x302   :  { %v1199_v62 = vmul.f32 -1.442695, %v548_v59  ;;  %v555_v30 = vadd.f32 %v1222_v63, %v503_v60 }
 0x303   :  { %v505_v23 = vpop.f32.mrf.mxu0  ;;  %v545_v25 = vpop.f32.mrf.mxu1 }
 0x304   :  { %1545 = vpow2.f32 %v1199_v62  ;;  %v1200_v31 = vmul.f32 -1.442695, %v555_v30 }
 0x305   :  { %v506_v28 = vpop.f32.mrf.mxu0  ;;  %v1378_v29 = vpop.f32.mrf.mxu1 }
 0x306   :  { %1547 = vpow2.f32 %v1200_v31 }
 0x311   :  { %v1546_v32 = vpop.eup %1545 }
 0x312   :  { %v552_v33 = vadd.f32 1.0, %v1546_v32 }
 0x313   :  { %v1548_v34 = vpop.eup %1547 }
 0x314   :  { %1549 = vrcp.f32 %v552_v33  ;;  %v559_v36 = vadd.f32 1.0, %v1548_v34 }
 0x316   :  { %1551 = vrcp.f32 %v559_v36 }
 0x321   :  { %v1550_v39 = vpop.eup %1549 }
 0x322   :  { %v563_v40 = vmul.f32 %v1550_v39, %v562_v38 }
 0x323   :  { %v1552_v42 = vpop.eup %1551 }
 0x324   :  { %v564_v41 = vadd.f32 %v563_v40, %v465_v37  ;;  %v566_v43 = vsub.f32 1.0, %v1552_v42  ;;  %v568_v47 = vmul.f32 %v1552_v42, %v1947_v53  ;;  %v1244_v53 = vld [vmem:[#allocation2 + $0x28] sm:$0xff]  }
 0x325   :  { %v1225_v58 = vunpack.c.l.bf16 %v1244_v53  ;;  %v1226_v32 = vunpack.c.h.bf16 %v1244_v53 }
 0x326   :  { %1553 = vtanh.f32 %v564_v41 }
 0x333   :  { %v1554_v44 = vpop.eup %1553 }
 0x334   :  { %v567_v45 = vmul.f32 %v1554_v44, %v566_v43  ;;  %v1228_v43 = vld [vmem:[#allocation2 + $0x30] sm:$0xff]  }
 0x335   :  { %v1229_v44 = vunpack.c.l.bf16 %v1228_v43 }
 0x336   :  { %v1989_v48 = vadd.f32 %v568_v47, %v567_v45 }
 0x338   :  { %571 = vst [vmem:[#allocation8 + $0x10] sm:$0xff] %v1989_v48  ;;  %v579_v49 = vpack.c.bf16 %v1989_v48, %v1989_v48 }
 0x33a   :  { %613 = vmatmul.mubr.bf16.vlgmr.msra.gmra.mxu0 %v579_v49  ;;  %1396 = vmatmul.mubr.bf16.vlgmr.msra.gmra.mxu1 %v579_v49 }
 0x33b   :  { %694 = vmatpush1.bf16.msra.mxu0 %v1780_v3  ;;  %1400 = vmatpush3.bf16.msra.mxu1 %v1797_v9 }
 0x33c   :  { %695 = vmatprep.subr.bf16.mxu0 %v1783_v4  ;;  %1401 = vmatprep.subr.bf16.mxu1 %v1728_v0 }
 0x33d   :  { %725 = vmatprep.mubr.bf16.mxu0 %v1729_v1  ;;  %1415 = vmatprep.mubr.msk.bf16.mxu1 %vm1730_vm0, %v1728_v0 }
 0x33f   :  { %696 = vmatpush1.bf16.msra.mxu0 %v1786_v5  ;;  %1402 = vmatpush3.bf16.msra.mxu1 %v1806_v12 }
 0x340   :  { %697 = vmatprep.subr.bf16.mxu0 %v1789_v6  ;;  %1403 = vmatprep.subr.bf16.mxu1 %v1728_v0 }
 0x343   :  { %698 = vmatpush1.bf16.msra.mxu0 %v1792_v7  ;;  %1404 = vmatpush3.bf16.msra.mxu1 %v1816_v15 }
 0x344   :  { %699 = vmatprep.subr.bf16.mxu0 %v1795_v8  ;;  %1405 = vmatprep.subr.bf16.mxu1 %v1728_v0 }
 0x347   :  { %700 = vmatpush1.bf16.msra.mxu0 %v1800_v10  ;;  %1406 = vmatpush3.bf16.msra.mxu1 %v1826_v18 }
 0x348   :  { %701 = vmatprep.subr.bf16.mxu0 %v1803_v11  ;;  %1407 = vmatprep.subr.bf16.mxu1 %v1728_v0 }
 0x34b   :  { %702 = vmatpush1.bf16.msra.mxu0 %v1809_v13  ;;  %1408 = vmatpush3.bf16.msra.mxu1 %v1836_v21 }
 0x34c   :  { %703 = vmatprep.subr.bf16.mxu0 %v1812_v14  ;;  %1409 = vmatprep.subr.bf16.mxu1 %v1728_v0 }
 0x34f   :  { %704 = vmatpush1.bf16.msra.mxu0 %v1820_v16  ;;  %1410 = vmatpush3.bf16.msra.mxu1 %v1846_v24 }
 0x350   :  { %705 = vmatprep.subr.bf16.mxu0 %v1823_v17  ;;  %1411 = vmatprep.subr.bf16.mxu1 %v1728_v0 }
 0x353   :  { %706 = vmatpush1.bf16.msra.mxu0 %v1830_v19  ;;  %1412 = vmatpush3.bf16.msra.mxu1 %v1853_v26 }
 0x354   :  { %707 = vmatprep.subr.bf16.mxu0 %v1833_v20  ;;  %1413 = vmatprep.subr.bf16.mxu1 %v1728_v0 }
 0x357   :  { %708 = vmatpush1.bf16.msra.mxu0 %v1840_v22  ;;  %1414 = vmatpush3.bf16.msra.mxu1 %v1860_v27 }
 0x358   :  { %806 = vmatprep.subr.bf16.mxu0 %v1778_v2  ;;  %1419 = vmatprep.subr.bf16.mxu1 %v1728_v0 }
 0x3fa   :  { %v614_v51 = vpop.f32.mrf.mxu0  ;;  %v655_v52 = vpop.f32.mrf.mxu1 }
 0x3fb   :  { %v661_v54 = vadd.f32 %v614_v51, %v576_v50  ;;  %v675_v31 = vadd.f32 %v1901_v46, %v655_v52  ;;  %v1230_v52 = vunpack.c.h.bf16 %v1228_v43 }
 0x3fc   :  { %v616_v55 = vpop.f32.mrf.mxu0  ;;  %v1397_v56 = vpop.f32.mrf.mxu1 }
 0x3fd   :  { %v1201_v57 = vmul.f32 -1.442695, %v661_v54  ;;  %v668_v63 = vadd.f32 %v1225_v58, %v616_v55 }
 0x3fe   :  { %v618_v59 = vpop.f32.mrf.mxu0  ;;  %v658_v60 = vpop.f32.mrf.mxu1 }
 0x3ff   :  { %1555 = vpow2.f32 %v1201_v57  ;;  %v1202_v23 = vmul.f32 -1.442695, %v668_v63 }
 0x400   :  { %v619_v61 = vpop.f32.mrf.mxu0  ;;  %v1398_v62 = vpop.f32.mrf.mxu1 }
 0x401   :  { %1557 = vpow2.f32 %v1202_v23  ;;  %v688_v62 = vld [vmem:[#allocation2 + $0x38] sm:$0xff]  }
 0x402   :  { %v691_v23 = vunpack.c.l.bf16 %v688_v62 }
 0x40c   :  { %v1556_v25 = vpop.eup %1555 }
 0x40d   :  { %v665_v28 = vadd.f32 1.0, %v1556_v25 }
 0x40e   :  { %v1558_v29 = vpop.eup %1557 }
 0x40f   :  { %1559 = vrcp.f32 %v665_v28  ;;  %v672_v30 = vadd.f32 1.0, %v1558_v29 }
 0x411   :  { %1561 = vrcp.f32 %v672_v30 }
 0x41c   :  { %v1560_v33 = vpop.eup %1559 }
 0x41d   :  { %v676_v34 = vmul.f32 %v1560_v33, %v675_v31 }
 0x41e   :  { %v1562_v36 = vpop.eup %1561 }
 0x41f   :  { %v677_v35 = vadd.f32 %v1226_v32, %v676_v34  ;;  %v679_v37 = vsub.f32 1.0, %v1562_v36  ;;  %v681_v40 = vmul.f32 %v1562_v36, %v1989_v48 }
 0x421   :  { %1563 = vtanh.f32 %v677_v35 }
 0x42e   :  { %v1564_v38 = vpop.eup %1563 }
 0x42f   :  { %v680_v39 = vmul.f32 %v1564_v38, %v679_v37 }
 0x431   :  { %v2031_v41 = vadd.f32 %v681_v40, %v680_v39 }
 0x433   :  { %684 = vst [vmem:[#allocation8 + $0x18] sm:$0xff] %v2031_v41  ;;  %v692_v42 = vpack.c.bf16 %v2031_v41, %v2031_v41 }
 0x435   :  { %726 = vmatmul.mubr.bf16.vlgmr.msra.gmra.mxu0 %v692_v42  ;;  %1416 = vmatmul.mubr.bf16.vlgmr.msra.gmra.mxu1 %v692_v42 }
 0x436   :  { %807 = vmatpush1.bf16.msra.mxu0 %v1780_v3  ;;  %1420 = vmatpush3.bf16.msra.mxu1 %v1797_v9 }
 0x437   :  { %808 = vmatprep.subr.bf16.mxu0 %v1783_v4  ;;  %1421 = vmatprep.subr.bf16.mxu1 %v1728_v0 }
 0x438   :  { %838 = vmatprep.mubr.bf16.mxu0 %v1729_v1  ;;  %1435 = vmatprep.mubr.msk.bf16.mxu1 %vm1730_vm0, %v1728_v0 }
 0x43a   :  { %809 = vmatpush1.bf16.msra.mxu0 %v1786_v5  ;;  %1422 = vmatpush3.bf16.msra.mxu1 %v1806_v12 }
 0x43b   :  { %810 = vmatprep.subr.bf16.mxu0 %v1789_v6  ;;  %1423 = vmatprep.subr.bf16.mxu1 %v1728_v0 }
 0x43e   :  { %811 = vmatpush1.bf16.msra.mxu0 %v1792_v7  ;;  %1424 = vmatpush3.bf16.msra.mxu1 %v1816_v15 }
 0x43f   :  { %812 = vmatprep.subr.bf16.mxu0 %v1795_v8  ;;  %1425 = vmatprep.subr.bf16.mxu1 %v1728_v0 }
 0x442   :  { %813 = vmatpush1.bf16.msra.mxu0 %v1800_v10  ;;  %1426 = vmatpush3.bf16.msra.mxu1 %v1826_v18 }
 0x443   :  { %814 = vmatprep.subr.bf16.mxu0 %v1803_v11  ;;  %1427 = vmatprep.subr.bf16.mxu1 %v1728_v0 }
 0x446   :  { %815 = vmatpush1.bf16.msra.mxu0 %v1809_v13  ;;  %1428 = vmatpush3.bf16.msra.mxu1 %v1836_v21 }
 0x447   :  { %816 = vmatprep.subr.bf16.mxu0 %v1812_v14  ;;  %1429 = vmatprep.subr.bf16.mxu1 %v1728_v0 }
 0x44a   :  { %817 = vmatpush1.bf16.msra.mxu0 %v1820_v16  ;;  %1430 = vmatpush3.bf16.msra.mxu1 %v1846_v24 }
 0x44b   :  { %818 = vmatprep.subr.bf16.mxu0 %v1823_v17  ;;  %1431 = vmatprep.subr.bf16.mxu1 %v1728_v0 }
 0x44e   :  { %819 = vmatpush1.bf16.msra.mxu0 %v1830_v19  ;;  %1432 = vmatpush3.bf16.msra.mxu1 %v1853_v26 }
 0x44f   :  { %820 = vmatprep.subr.bf16.mxu0 %v1833_v20  ;;  %1433 = vmatprep.subr.bf16.mxu1 %v1728_v0 }
 0x452   :  { %821 = vmatpush1.bf16.msra.mxu0 %v1840_v22  ;;  %1434 = vmatpush3.bf16.msra.mxu1 %v1860_v27 }
 0x453   :  { %919 = vmatprep.subr.bf16.mxu0 %v1778_v2  ;;  %1439 = vmatprep.subr.bf16.mxu1 %v1728_v0 }
 0x4f5   :  { %v727_v45 = vpop.f32.mrf.mxu0  ;;  %v768_v47 = vpop.f32.mrf.mxu1 }
 0x4f6   :  { %v774_v48 = vadd.f32 %v1229_v44, %v727_v45  ;;  %v788_v25 = vadd.f32 %v1901_v46, %v768_v47 }
 0x4f7   :  { %v729_v49 = vpop.f32.mrf.mxu0  ;;  %v1417_v50 = vpop.f32.mrf.mxu1 }
 0x4f8   :  { %v1203_v51 = vmul.f32 -1.442695, %v774_v48  ;;  %v781_v57 = vadd.f32 %v1230_v52, %v729_v49 }
 0x4f9   :  { %v731_v53 = vpop.f32.mrf.mxu0  ;;  %v771_v54 = vpop.f32.mrf.mxu1 }
 0x4fa   :  { %1565 = vpow2.f32 %v1203_v51  ;;  %v1204_v58 = vmul.f32 -1.442695, %v781_v57 }
 0x4fb   :  { %v732_v55 = vpop.f32.mrf.mxu0  ;;  %v1418_v56 = vpop.f32.mrf.mxu1 }
 0x4fc   :  { %1567 = vpow2.f32 %v1204_v58 }
 0x507   :  { %v1566_v59 = vpop.eup %1565 }
 0x508   :  { %v778_v60 = vadd.f32 1.0, %v1566_v59 }
 0x509   :  { %v1568_v61 = vpop.eup %1567 }
 0x50a   :  { %1569 = vrcp.f32 %v778_v60  ;;  %v785_v63 = vadd.f32 1.0, %v1568_v61  ;;  %v1605_v61 = vld [vmem:[#allocation7 + $0xa8] ss:$12 sps:$4 sm:$0xff]  }
 0x50c   :  { %1571 = vrcp.f32 %v785_v63  ;;  %v1607_v63 = vld [vmem:[#allocation7 + $0x90] ss:$12 sps:$4 sm:$0xff]  }
 0x517   :  { %v1570_v28 = vpop.eup %1569 }
 0x518   :  { %v789_v29 = vmul.f32 %v1570_v28, %v788_v25  ;;  %v1609_v25 = vld [vmem:[#allocation7 + $0x78] ss:$12 sps:$4 sm:$0xff]  }
 0x519   :  { %v1572_v31 = vpop.eup %1571  ;;  %v1612_v28 = vld [vmem:[#allocation7 + $0x4c] ss:$12 sps:$4 sm:$0xff]  }
 0x51a   :  { %v790_v30 = vadd.f32 %v789_v29, %v691_v23  ;;  %v792_v32 = vsub.f32 1.0, %v1572_v31  ;;  %v794_v35 = vmul.f32 %v1572_v31, %v2031_v41  ;;  %v1608_v23 = vld [vmem:[#allocation7 + $0x7c] ss:$12 sps:$4 sm:$0xff]  }
 0x51c   :  { %1573 = vtanh.f32 %v790_v30 }
 0x529   :  { %v1574_v33 = vpop.eup %1573 }
 0x52a   :  { %v793_v34 = vmul.f32 %v1574_v33, %v792_v32  ;;  %v914_v32 = vld [vmem:[#allocation2 + $0x50] sm:$0xff]  }
 0x52c   :  { %v2073_v36 = vadd.f32 %v794_v35, %v793_v34  ;;  %v917_v34 = vunpack.c.l.bf16 %v914_v32 }
 0x52e   :  { %797 = vst [vmem:[#allocation8 + $0x20] sm:$0xff] %v2073_v36  ;;  %v805_v37 = vpack.c.bf16 %v2073_v36, %v2073_v36 }
 0x530   :  { %839 = vmatmul.mubr.bf16.vlgmr.msra.gmra.mxu0 %v805_v37  ;;  %1436 = vmatmul.mubr.bf16.vlgmr.msra.gmra.mxu1 %v805_v37 }
 0x531   :  { %920 = vmatpush1.bf16.msra.mxu0 %v1780_v3  ;;  %1440 = vmatpush3.bf16.msra.mxu1 %v1797_v9  ;;  %v802_v3 = vunpack.c.h.bf16 %v688_v62  ;;  %v1606_v62 = vld [vmem:[#allocation7 + $0x94] ss:$12 sps:$4 sm:$0xff]  }
 0x532   :  { %921 = vmatprep.subr.bf16.mxu0 %v1783_v4  ;;  %1441 = vmatprep.subr.bf16.mxu1 %v1728_v0 }
 0x533   :  { %951 = vmatprep.mubr.bf16.mxu0 %v1729_v1  ;;  %1455 = vmatprep.mubr.msk.bf16.mxu1 %vm1730_vm0, %v1728_v0 }
 0x535   :  { %922 = vmatpush1.bf16.msra.mxu0 %v1786_v5  ;;  %1442 = vmatpush3.bf16.msra.mxu1 %v1806_v12 }
 0x536   :  { %923 = vmatprep.subr.bf16.mxu0 %v1789_v6  ;;  %1443 = vmatprep.subr.bf16.mxu1 %v1728_v0  ;;  %v1245_v6 = vld [vmem:[#allocation2 + $0x40] sm:$0xff]  }
 0x537   :  { %v1233_v38 = vunpack.c.l.bf16 %v1245_v6  ;;  %v1234_v50 = vunpack.c.h.bf16 %v1245_v6 }
 0x539   :  { %924 = vmatpush1.bf16.msra.mxu0 %v1792_v7  ;;  %1444 = vmatpush3.bf16.msra.mxu1 %v1816_v15 }
 0x53a   :  { %925 = vmatprep.subr.bf16.mxu0 %v1795_v8  ;;  %1445 = vmatprep.subr.bf16.mxu1 %v1728_v0 }
 0x53d   :  { %926 = vmatpush1.bf16.msra.mxu0 %v1800_v10  ;;  %1446 = vmatpush3.bf16.msra.mxu1 %v1826_v18 }
 0x53e   :  { %927 = vmatprep.subr.bf16.mxu0 %v1803_v11  ;;  %1447 = vmatprep.subr.bf16.mxu1 %v1728_v0 }
 0x541   :  { %928 = vmatpush1.bf16.msra.mxu0 %v1809_v13  ;;  %1448 = vmatpush3.bf16.msra.mxu1 %v1836_v21 }
 0x542   :  { %929 = vmatprep.subr.bf16.mxu0 %v1812_v14  ;;  %1449 = vmatprep.subr.bf16.mxu1 %v1728_v0 }
 0x545   :  { %930 = vmatpush1.bf16.msra.mxu0 %v1820_v16  ;;  %1450 = vmatpush3.bf16.msra.mxu1 %v1846_v24 }
 0x546   :  { %931 = vmatprep.subr.bf16.mxu0 %v1823_v17  ;;  %1451 = vmatprep.subr.bf16.mxu1 %v1728_v0 }
 0x549   :  { %932 = vmatpush1.bf16.msra.mxu0 %v1830_v19  ;;  %1452 = vmatpush3.bf16.msra.mxu1 %v1853_v26 }
 0x54a   :  { %933 = vmatprep.subr.bf16.mxu0 %v1833_v20  ;;  %1453 = vmatprep.subr.bf16.mxu1 %v1728_v0 }
 0x54d   :  { %934 = vmatpush1.bf16.msra.mxu0 %v1840_v22  ;;  %1454 = vmatpush3.bf16.msra.mxu1 %v1860_v27 }
 0x54e   :  { %1032 = vmatprep.subr.bf16.mxu0 %v1778_v2  ;;  %1459 = vmatprep.subr.bf16.mxu1 %v1728_v0 }
 0x5f0   :  { %v840_v4 = vpop.f32.mrf.mxu0  ;;  %v881_v5 = vpop.f32.mrf.mxu1 }
 0x5f1   :  { %v887_v7 = vadd.f32 %v840_v4, %v802_v3  ;;  %v901_v49 = vadd.f32 %v1901_v46, %v881_v5 }
 0x5f2   :  { %v842_v8 = vpop.f32.mrf.mxu0  ;;  %v1437_v10 = vpop.f32.mrf.mxu1 }
 0x5f3   :  { %v1205_v11 = vmul.f32 -1.442695, %v887_v7  ;;  %v894_v43 = vadd.f32 %v1233_v38, %v842_v8  ;;  %v1028_v38 = vunpack.c.h.bf16 %v914_v32 }
 0x5f4   :  { %v844_v39 = vpop.f32.mrf.mxu0  ;;  %v884_v40 = vpop.f32.mrf.mxu1 }
 0x5f5   :  { %1575 = vpow2.f32 %v1205_v11  ;;  %v1206_v44 = vmul.f32 -1.442695, %v894_v43 }
 0x5f6   :  { %v845_v41 = vpop.f32.mrf.mxu0  ;;  %v1438_v42 = vpop.f32.mrf.mxu1 }
 0x5f7   :  { %1577 = vpow2.f32 %v1206_v44  ;;  %v1246_v41 = vld [vmem:[#allocation2 + $0x58] sm:$0xff]  }
 0x602   :  { %v1576_v2 = vpop.eup %1575 }
 0x603   :  { %v891_v45 = vadd.f32 1.0, %v1576_v2 }
 0x604   :  { %v1578_v47 = vpop.eup %1577 }
 0x605   :  { %1579 = vrcp.f32 %v891_v45  ;;  %v898_v48 = vadd.f32 1.0, %v1578_v47  ;;  %v1241_v45 = vunpack.c.l.bf16 %v1246_v41 }
 0x607   :  { %1581 = vrcp.f32 %v898_v48 }
 0x612   :  { %v1580_v51 = vpop.eup %1579 }
 0x613   :  { %v902_v52 = vmul.f32 %v1580_v51, %v901_v49 }
 0x614   :  { %v1582_v54 = vpop.eup %1581 }
 0x615   :  { %v903_v53 = vadd.f32 %v1234_v50, %v902_v52  ;;  %v905_v55 = vsub.f32 1.0, %v1582_v54  ;;  %v907_v58 = vmul.f32 %v1582_v54, %v2073_v36 }
 0x617   :  { %1583 = vtanh.f32 %v903_v53 }
 0x624   :  { %v1584_v56 = vpop.eup %1583 }
 0x625   :  { %v906_v57 = vmul.f32 %v1584_v56, %v905_v55 }
 0x627   :  { %v2115_v59 = vadd.f32 %v907_v58, %v906_v57  ;;  %v1242_v58 = vunpack.c.h.bf16 %v1246_v41 }
 0x629   :  { %910 = vst [vmem:[#allocation8 + $0x28] sm:$0xff] %v2115_v59  ;;  %v918_v60 = vpack.c.bf16 %v2115_v59, %v2115_v59 }
 0x62b   :  { %952 = vmatmul.mubr.bf16.vlgmr.msra.gmra.mxu0 %v918_v60  ;;  %1456 = vmatmul.mubr.bf16.vlgmr.msra.gmra.mxu1 %v918_v60 }
 0x62c   :  { %1033 = vmatpush1.bf16.msra.mxu0 %v1605_v61  ;;  %1460 = vmatpush3.bf16.msra.mxu1 %v1797_v9  ;;  %v1610_v9 = vld [vmem:[#allocation7 + $0x64] ss:$12 sps:$4 sm:$0xff]  }
 0x62d   :  { %1034 = vmatprep.subr.bf16.mxu0 %v1606_v62  ;;  %1461 = vmatprep.subr.bf16.mxu1 %v1728_v0 }
 0x62e   :  { %1064 = vmatprep.mubr.bf16.mxu0 %v1729_v1  ;;  %1475 = vmatprep.mubr.msk.bf16.mxu1 %vm1730_vm0, %v1728_v0  ;;  %v1611_v1 = vld [vmem:[#allocation7 + $0x60] ss:$12 sps:$4 sm:$0xff]  }
 0x630   :  { %1035 = vmatpush1.bf16.msra.mxu0 %v1607_v63  ;;  %1462 = vmatpush3.bf16.msra.mxu1 %v1806_v12  ;;  %v1236_v12 = vld [vmem:[#allocation2 + $0x48] sm:$0xff]  }
 0x631   :  { %1036 = vmatprep.subr.bf16.mxu0 %v1608_v23  ;;  %1463 = vmatprep.subr.bf16.mxu1 %v1728_v0 }
 0x634   :  { %1037 = vmatpush1.bf16.msra.mxu0 %v1609_v25  ;;  %1464 = vmatpush3.bf16.msra.mxu1 %v1816_v15 }
 0x635   :  { %1038 = vmatprep.subr.bf16.mxu0 %v1610_v9  ;;  %1465 = vmatprep.subr.bf16.mxu1 %v1728_v0 }
 0x638   :  { %1039 = vmatpush1.bf16.msra.mxu0 %v1611_v1  ;;  %1466 = vmatpush3.bf16.msra.mxu1 %v1826_v18 }
 0x639   :  { %1040 = vmatprep.subr.bf16.mxu0 %v1612_v28  ;;  %1467 = vmatprep.subr.bf16.mxu1 %v1728_v0 }
 0x63c   :  { %1041 = vmatpush1.bf16.msra.mxu0 %v1809_v13  ;;  %1468 = vmatpush3.bf16.msra.mxu1 %v1836_v21  ;;  %v1237_v13 = vunpack.c.l.bf16 %v1236_v12 }
 0x63d   :  { %1042 = vmatprep.subr.bf16.mxu0 %v1812_v14  ;;  %1469 = vmatprep.subr.bf16.mxu1 %v1728_v0 }
 0x640   :  { %1043 = vmatpush1.bf16.msra.mxu0 %v1820_v16  ;;  %1470 = vmatpush3.bf16.msra.mxu1 %v1846_v24  ;;  %v1238_v24 = vunpack.c.h.bf16 %v1236_v12 }
 0x641   :  { %1044 = vmatprep.subr.bf16.mxu0 %v1823_v17  ;;  %1471 = vmatprep.subr.bf16.mxu1 %v1728_v0 }
 0x644   :  { %1045 = vmatpush1.bf16.msra.mxu0 %v1830_v19  ;;  %1472 = vmatpush3.bf16.msra.mxu1 %v1853_v26 }
 0x645   :  { %1046 = vmatprep.subr.bf16.mxu0 %v1833_v20  ;;  %1473 = vmatprep.subr.bf16.mxu1 %v1728_v0 }
 0x648   :  { %1047 = vmatpush1.bf16.msra.mxu0 %v1840_v22  ;;  %1474 = vmatpush3.bf16.msra.mxu1 %v1860_v27 }
 0x6eb   :  { %v953_v14 = vpop.f32.mrf.mxu0  ;;  %v994_v15 = vpop.f32.mrf.mxu1 }
 0x6ec   :  { %v1000_v16 = vadd.f32 %v1237_v13, %v953_v14  ;;  %v1014_v35 = vadd.f32 %v1901_v46, %v994_v15 }
 0x6ed   :  { %v955_v17 = vpop.f32.mrf.mxu0  ;;  %v1457_v18 = vpop.f32.mrf.mxu1 }
 0x6ee   :  { %v1207_v21 = vmul.f32 -1.442695, %v1000_v16  ;;  %v1007_v30 = vadd.f32 %v1238_v24, %v955_v17 }
 0x6ef   :  { %v957_v19 = vpop.f32.mrf.mxu0  ;;  %v997_v29 = vpop.f32.mrf.mxu1 }
 0x6f0   :  { %1585 = vpow2.f32 %v1207_v21  ;;  %v1208_v0 = vmul.f32 -1.442695, %v1007_v30 }
 0x6f1   :  { %v958_v26 = vpop.f32.mrf.mxu0  ;;  %v1458_v20 = vpop.f32.mrf.mxu1 }
 0x6f2   :  { %1587 = vpow2.f32 %v1208_v0 }
 0x6fd   :  { %v1586_v22 = vpop.eup %1585 }
 0x6fe   :  { %v1004_v31 = vadd.f32 1.0, %v1586_v22 }
 0x6ff   :  { %v1588_v27 = vpop.eup %1587 }
 0x700   :  { %1589 = vrcp.f32 %v1004_v31  ;;  %v1011_v33 = vadd.f32 1.0, %v1588_v27 }
 0x702   :  { %1591 = vrcp.f32 %v1011_v33 }
 0x70d   :  { %v1590_v36 = vpop.eup %1589 }
 0x70e   :  { %v1015_v37 = vmul.f32 %v1590_v36, %v1014_v35 }
 0x70f   :  { %v1592_v4 = vpop.eup %1591 }
 0x710   :  { %v1016_v3 = vadd.f32 %v1015_v37, %v917_v34  ;;  %v1018_v5 = vsub.f32 1.0, %v1592_v4  ;;  %v1020_v8 = vmul.f32 %v1592_v4, %v2115_v59 }
 0x712   :  { %1593 = vtanh.f32 %v1016_v3 }
 0x71f   :  { %v1594_v6 = vpop.eup %1593 }
 0x720   :  { %v1019_v7 = vmul.f32 %v1594_v6, %v1018_v5 }
 0x722   :  { %v1021_v10 = vadd.f32 %v1020_v8, %v1019_v7 }
 0x724   :  { %1023 = vst [vmem:[#allocation8 + $0x30] sm:$0xff] %v1021_v10  ;;  %v1031_v11 = vpack.c.bf16 %v1021_v10, %v1021_v10 }
 0x726   :  { %1065 = vmatmul.mubr.bf16.vlgmr.msra.gmra.mxu0 %v1031_v11  ;;  %1476 = vmatmul.mubr.bf16.vlgmr.msra.gmra.mxu1 %v1031_v11 }
 0x7e6   :  { %v1066_v39 = vpop.f32.mrf.mxu0  ;;  %v1107_v40 = vpop.f32.mrf.mxu1 }
 0x7e7   :  { %v1113_v42 = vadd.f32 %v1066_v39, %v1028_v38  ;;  %v1127_v57 = vadd.f32 %v1901_v46, %v1107_v40 }
 0x7e8   :  { %v1068_v43 = vpop.f32.mrf.mxu0  ;;  %v1477_v44 = vpop.f32.mrf.mxu1 }
 0x7e9   :  { %v1209_v2 = vmul.f32 -1.442695, %v1113_v42  ;;  %v1120_v51 = vadd.f32 %v1241_v45, %v1068_v43 }
 0x7ea   :  { %v1070_v47 = vpop.f32.mrf.mxu0  ;;  %v1110_v48 = vpop.f32.mrf.mxu1 }
 0x7eb   :  { %1595 = vpow2.f32 %v1209_v2  ;;  %v1210_v52 = vmul.f32 -1.442695, %v1120_v51 }
 0x7ec   :  { %v1071_v49 = vpop.f32.mrf.mxu0  ;;  %v1478_v50 = vpop.f32.mrf.mxu1 }
 0x7ed   :  { %1597 = vpow2.f32 %v1210_v52 }
 0x7f8   :  { %v1596_v53 = vpop.eup %1595 }
 0x7f9   :  { %v1117_v54 = vadd.f32 1.0, %v1596_v53 }
 0x7fa   :  { %v1598_v55 = vpop.eup %1597 }
 0x7fb   :  { %1599 = vrcp.f32 %v1117_v54  ;;  %v1124_v56 = vadd.f32 1.0, %v1598_v55 }
 0x7fd   :  { %1601 = vrcp.f32 %v1124_v56 }
 0x808   :  { %v1600_v59 = vpop.eup %1599 }
 0x809   :  { %v1128_v60 = vmul.f32 %v1600_v59, %v1127_v57 }
 0x80a   :  { %v1602_v62 = vpop.eup %1601 }
 0x80b   :  { %v1129_v61 = vadd.f32 %v1242_v58, %v1128_v60  ;;  %v1131_v63 = vsub.f32 1.0, %v1602_v62  ;;  %v1133_v9 = vmul.f32 %v1602_v62, %v1021_v10 }
 0x80d   :  { %1603 = vtanh.f32 %v1129_v61 }
 0x81a   :  { %v1604_v23 = vpop.eup %1603 }
 0x81b   :  { %v1132_v25 = vmul.f32 %v1604_v23, %v1131_v63 }
 0x81d   :  { %v1134_v1 = vadd.f32 %v1133_v9, %v1132_v25 }
 0x81f   :  { %1136 = vst [vmem:[#allocation8 + $0x38] sm:$0xff] %v1134_v1  ;;  %1137 = vst [vmem:[#allocation9] sm:$0xff] %v1134_v1 }
 0x820   :  { %1684 = shalt.err (!%p1681_p5)
}
 0x821   :  { %s1733_s15 = smov 128   ;;  %s1734_s16 = smov 8  }
 0x822   :  { %1149 = dma.vmem_to_hbm [thread:$0]  %s1144_s11, 1024, %s2158_s4, [#allocation4], %s1733_s15, %s1733_s15, %s1734_s16  }
 0x823   :  { %s1693_s19 = scalar_lea.vmem %s1157_s13, 128  ;;  %p1698_p7 = scmp.lt.s32.totalorder %s1157_s13, %s1157_s13 }
 0x824   :  { %p1694_p6 = scmp.ne.s32.totalorder %s1157_s13, %s1693_s19  ;;  %p1699_p8 = scmp.lt.s32.totalorder %s1693_s19, %s1693_s19 }
 0x826   :  { %p1700_p9 = por %p1699_p8, %p1698_p7 }
 0x828   :  { %p1701_p10 = pnand %p1700_p9, %p1694_p6 }
 0x82a   :  { %1704 = shalt.err (!%p1701_p10)
}
 0x82b   :  { %1159 = dma.vmem_to_hbm [thread:$0]  %s1157_s13, 128, %s2159_s5, [#allocation10]  }
 0x82c   :  { %1717 = dma.done.wait [#allocation4], 1024  }
 0x82d   :  { %1718 = vsyncadd [#allocation4], 4294966272 }
 0x82e   :  { %1719 = dma.done.wait [#allocation10], 128  }
 0x82f   :  { %1720 = vsyncadd [#allocation10], 4294967168 }
 0x830   :  { %1166 = vsyncpa [#allocation3], 1 }
 0x831   :  { %1167 = vsyncpa [#allocation6], 1 }
 0x832   :  { %1168 = vsyncpa [#allocation4], 1 }
 0x833   :  { %1169 = vsyncpa [#allocation10], 1 }

</bundles_post_ra>
